<compile_context>
chip_gen: v5e
topology: v5e:2x2
jax: 0.10.0
libtpu: 0.0.40
codegen_flags: <defaults>
</compile_context>

<pallas_src>
import jax
import jax.numpy as jnp
from jax import lax
from jax.experimental import pallas as pl
from jax.experimental.pallas import tpu as pltpu


def _round_up(x, m):
    return ((x + m - 1) // m) * m


def _make_rnn_kernel(seq, tq, batch_pad, hidden_pad, vocab_pad, num_chunks,
                     mm_dtype, mm_precision):
    chunk_rows = tq * batch_pad
    needs_tail_mask = (seq % tq) != 0          # static: only the tail chunk has padded steps
    hoist_whh = hidden_pad <= 256              # avoid holding a huge W_hh value across the unroll

    def kernel(h0_ref,      # (batch_pad, hidden_pad) f32
               xp_ref,      # (chunk_rows, hidden_pad) f32  : gathered W_ih^T rows (+ bias), chunk i
               whh_ref,     # (hidden_pad, hidden_pad) mm   : W_hh^T
               wl_ref,      # (hidden_pad, vocab_pad) mm    : W_lin^T
               blin_ref,    # (1, vocab_pad) f32
               out_ref,     # (chunk_rows, vocab_pad)       : logits block (chunk i-1)
               hn_ref,      # (batch_pad, hidden_pad) f32
               h_scr,       # (batch_pad, hidden_pad) f32   : persistent hidden-state carry
               hs_scr):     # (2*chunk_rows, hidden_pad) mm : double-buffered chunk hidden states
        chunk = pl.program_id(0)
        slot = chunk % 2

        @pl.when(chunk == 0)
        def _():
            h_scr[...] = h0_ref[...]
            hs_scr[...] = jnp.zeros_like(hs_scr)   # warm-up Phase-3 reads deterministic zeros
            hn_ref[...] = h0_ref[...]              # robust init of the resident output block

        # ---- Output projection for the PREVIOUS chunk (software-pipelined). ----
        # No data dependence on this iteration's recurrence: the MXU-throughput
        # matmul gets hidden under the latency-bound serial chain below.
        prev_off = pl.multiple_of((1 - slot) * chunk_rows, chunk_rows)
        hs_prev = hs_scr[pl.ds(prev_off, chunk_rows), :]
        out_ref[...] = (jnp.dot(hs_prev, wl_ref[...],
                                preferred_element_type=jnp.float32,
                                precision=mm_precision)
                        + blin_ref[...]).astype(out_ref.dtype)

        # ---- Serial recurrence for the CURRENT chunk: h <- tanh(xp[t] + h @ W_hh^T). ----
        whh_val = whh_ref[...] if hoist_whh else None

        def step(lt, h_prev):
            row0 = pl.multiple_of(lt * batch_pad, batch_pad)
            whh = whh_val if hoist_whh else whh_ref[...]
            pre = xp_ref[pl.ds(row0, batch_pad), :] + jnp.dot(
                h_prev.astype(mm_dtype), whh,
                preferred_element_type=jnp.float32, precision=mm_precision)
            h_new = jnp.tanh(pre)                           # f32 on VPU/EUP (v5e-safe)
            dst = pl.multiple_of(slot * chunk_rows + lt * batch_pad, batch_pad)
            hs_scr[pl.ds(dst, batch_pad), :] = h_new.astype(mm_dtype)
            if needs_tail_mask:
                # Freeze the f32 carry on padded time steps (cheap select, no scf.if).
                h_new = jnp.where(chunk * tq + lt < seq, h_new, h_prev)
            return h_new

        h_final = lax.fori_loop(0, tq, step, h_scr[...], unroll=True)
        h_scr[...] = h_final

        @pl.when(chunk == num_chunks - 1)
        def _():
            hn_ref[...] = h_final

    return kernel


def rnn_model_forward(inputs, state, params, vocab_size, *, seq_chunk=None,
                      use_bf16=True, logits_dtype=jnp.float32):
    """Pallas-backed equivalent of RNNModel.forward.

    inputs: (batch, seq) integer token ids
    state : (1, batch, hidden) f32
    returns (output (seq*batch, vocab), new_state (1, batch, hidden) f32)
    """
    wih, whh = params["w_ih"], params["w_hh"]
    bih, bhh = params["b_ih"], params["b_hh"]
    wl, bl = params["w_lin"], params["b_lin"]

    batch, seq = inputs.shape
    hidden = whh.shape[0]

    batch_pad = _round_up(batch, 8)          # sublane
    hidden_pad = _round_up(hidden, 128)      # lane
    vocab_pad = _round_up(vocab_size, 128)   # lane-dense output

    # tq*batch_pad >= 256 LHS rows keeps the pipelined output matmul shaped for the
    # 256-wide MXU on v6e/v7x (v5e works fine too at these sizes).
    tq = seq_chunk if seq_chunk is not None else min(seq, 32)
    seq_pad = _round_up(seq, tq)
    num_chunks = seq_pad // tq
    chunk_rows = tq * batch_pad

    mm_dtype = jnp.bfloat16 if use_bf16 else jnp.float32
    mm_precision = None if use_bf16 else jax.lax.Precision.HIGHEST

    # --- Wrapper-side input projection (replaces the old in-kernel gather). ---
    # one_hot(x) @ W_ih^T == W_ih^T[x]; fold the RNN bias so each gathered row is the
    # full per-token pre-activation contribution (done once by XLA).
    wihb = wih.T.astype(jnp.float32) + (bih + bhh).astype(jnp.float32)[None, :]  # (V, H)
    ids_tm = jnp.transpose(inputs).astype(jnp.int32)                             # (S, B)
    xp = jnp.take(wihb, ids_tm, axis=0)                                          # (S, B, H)
    # Pad: time -> seq_pad plus one extra zero "flush" chunk, batch -> 8, hidden -> 128.
    # Zero padded batch rows keep their hidden state exactly 0 through the recurrence.
    xp = jnp.pad(xp, ((0, seq_pad + tq - seq),
                      (0, batch_pad - batch),
                      (0, hidden_pad - hidden)))
    xp_flat = xp.reshape((num_chunks + 1) * chunk_rows, hidden_pad)

    # Pre-transposed, zero-padded weights (no in-kernel XLU transpose).
    whh_t = jnp.pad(whh.T.astype(jnp.float32),
                    ((0, hidden_pad - hidden), (0, hidden_pad - hidden))).astype(mm_dtype)
    wl_t = jnp.pad(wl.T.astype(jnp.float32),
                   ((0, hidden_pad - hidden), (0, vocab_pad - vocab_size))).astype(mm_dtype)
    b_lin = jnp.pad(bl.astype(jnp.float32),
                    (0, vocab_pad - vocab_size)).reshape(1, vocab_pad)
    h0 = jnp.pad(state[0].astype(jnp.float32),
                 ((0, batch_pad - batch), (0, hidden_pad - hidden)))

    kernel = _make_rnn_kernel(seq, tq, batch_pad, hidden_pad, vocab_pad,
                              num_chunks, mm_dtype, mm_precision)

    # VMEM budget derived from the actual working set (double-buffered streamed blocks),
    # capped below v7x's 64 MiB with headroom.
    mm_sz = jnp.dtype(mm_dtype).itemsize
    out_sz = jnp.dtype(logits_dtype).itemsize
    vmem_est = (2 * chunk_rows * hidden_pad * 4            # xp blocks (double-buffered)
                + 2 * chunk_rows * vocab_pad * out_sz      # logits blocks (double-buffered)
                + hidden_pad * hidden_pad * mm_sz          # W_hh^T
                + hidden_pad * vocab_pad * mm_sz           # W_lin^T
                + vocab_pad * 4                            # b_lin
                + 3 * batch_pad * hidden_pad * 4           # h0, h_n, h carry
                + 2 * chunk_rows * hidden_pad * mm_sz)     # hs double buffer
    vmem_limit = int(min(max(2 * vmem_est, 8 << 20), 48 << 20))
    # TODO(synk): for very large vocab on v7x (64 MiB VMEM), add a second grid axis tiling
    # W_lin^T / logits over vocab, and a batch-parallel axis to use the second TensorCore.

    grid_spec = pltpu.PrefetchScalarGridSpec(
        num_scalar_prefetch=0,
        grid=(num_chunks + 1,),             # +1 flush iteration drains the pipelined matmul
        in_specs=[
            pl.BlockSpec((batch_pad, hidden_pad), lambda i: (0, 0)),     # h0 (resident)
            pl.BlockSpec((chunk_rows, hidden_pad), lambda i: (i, 0)),    # xp (streamed)
            pl.BlockSpec((hidden_pad, hidden_pad), lambda i: (0, 0)),    # W_hh^T (resident)
            pl.BlockSpec((hidden_pad, vocab_pad), lambda i: (0, 0)),     # W_lin^T (resident)
            pl.BlockSpec((1, vocab_pad), lambda i: (0, 0)),              # b_lin (resident)
        ],
        out_specs=(
            pl.BlockSpec((chunk_rows, vocab_pad), lambda i: (i, 0)),     # logits of chunk i-1
            pl.BlockSpec((batch_pad, hidden_pad), lambda i: (0, 0)),     # h_n (resident)
        ),
        scratch_shapes=[
            pltpu.VMEM((batch_pad, hidden_pad), jnp.float32),            # h carry (f32)
            pltpu.VMEM((2 * chunk_rows, hidden_pad), mm_dtype),          # hs double buffer
        ],
    )

    out_pad, hn_pad = pl.pallas_call(
        kernel,
        out_shape=(
            jax.ShapeDtypeStruct(((num_chunks + 1) * chunk_rows, vocab_pad), logits_dtype),
            jax.ShapeDtypeStruct((batch_pad, hidden_pad), jnp.float32),
        ),
        grid_spec=grid_spec,
        compiler_params=pltpu.CompilerParams(
            dimension_semantics=("arbitrary",),     # recurrence carried across chunks
            vmem_limit_bytes=vmem_limit,
        ),
    )(h0, xp_flat, whh_t, wl_t, b_lin)

    # Drop the warm-up block (iteration 0 writes the "chunk -1" slot), strip padding.
    out = out_pad.reshape(num_chunks + 1, tq, batch_pad, vocab_pad)[1:]
    out = out.reshape(seq_pad, batch_pad, vocab_pad)[:seq, :batch, :vocab_size]
    output = out.reshape(seq * batch, vocab_size)
    new_state = hn_pad[:batch, :hidden][None]
    return output, new_state


def rnn_model_reference(inputs, state, params, vocab_size):
    """Pure-JAX f32 reference mirroring the PyTorch module (for validation)."""
    with jax.default_matmul_precision("highest"):
        x = jax.nn.one_hot(jnp.transpose(inputs).astype(jnp.int32), vocab_size,
                           dtype=jnp.float32)                  # (seq, batch, vocab)
        w_ih, w_hh = params["w_ih"], params["w_hh"]
        b = params["b_ih"] + params["b_hh"]

        def step(h, x_t):
            h_new = jnp.tanh(x_t @ w_ih.T + h @ w_hh.T + b)
            return h_new, h_new

        h_last, ys = lax.scan(step, state[0], x)
        out = ys.reshape(-1, ys.shape[-1]) @ params["w_lin"].T + params["b_lin"]
    return out, h_last[None]


def init_params(key, vocab_size, num_hiddens):
    """Deterministic synthetic parameters with PyTorch-equivalent shapes."""
    ks = jax.random.split(key, 6)
    s = 0.1
    return {
        "w_ih": (jax.random.normal(ks[0], (num_hiddens, vocab_size)) * s).astype(jnp.float32),
        "w_hh": (jax.random.normal(ks[1], (num_hiddens, num_hiddens)) * s).astype(jnp.float32),
        "b_ih": (jax.random.normal(ks[2], (num_hiddens,)) * s).astype(jnp.float32),
        "b_hh": (jax.random.normal(ks[3], (num_hiddens,)) * s).astype(jnp.float32),
        "w_lin": (jax.random.normal(ks[4], (vocab_size, num_hiddens)) * s).astype(jnp.float32),
        "b_lin": (jax.random.normal(ks[5], (vocab_size,)) * s).astype(jnp.float32),
    }


if __name__ == "__main__":
    vocab_size = 32
    num_hiddens = 32
    batch_size = 2
    seq_len = 8

    key = jax.random.PRNGKey(0)
    k_inp, k_par = jax.random.split(key)

    params = init_params(k_par, vocab_size, num_hiddens)
    inputs = jax.random.randint(k_inp, (batch_size, seq_len), 0, vocab_size,
                                dtype=jnp.int32)
    # begin_state(num_hiddens, device, batch_size, num_layers=1)
    state = jnp.zeros((1, batch_size, num_hiddens), dtype=jnp.float32)

    ref_out, ref_hn = rnn_model_reference(inputs, state, params, vocab_size)

    # f32 MXU path: tight check against the pure-JAX reference.
    out32, hn32 = rnn_model_forward(inputs, state, params, vocab_size, use_bf16=False)
    jax.block_until_ready((out32, hn32))
    assert out32.shape == (seq_len * batch_size, vocab_size)
    assert hn32.shape == (1, batch_size, num_hiddens)
    assert float(jnp.max(jnp.abs(out32 - ref_out))) < 5e-3
    assert float(jnp.max(jnp.abs(hn32 - ref_hn))) < 5e-3

    # Default fast path (bf16 MXU operands / bf16 hidden-state scratch, f32 accumulation,
    # f32 state carry).
    out_bf, hn_bf = rnn_model_forward(inputs, state, params, vocab_size, use_bf16=True)
    jax.block_until_ready((out_bf, hn_bf))
    assert out_bf.shape == (seq_len * batch_size, vocab_size)
    assert hn_bf.shape == (1, batch_size, num_hiddens)
    assert float(jnp.max(jnp.abs(out_bf - ref_out))) < 2.5e-1
    assert float(jnp.max(jnp.abs(hn_bf - ref_hn))) < 2.5e-1

    # Non-divisible seq chunk exercises the tail-mask path.
    out_t, hn_t = rnn_model_forward(inputs, state, params, vocab_size,
                                    seq_chunk=3, use_bf16=False)
    jax.block_until_ready((out_t, hn_t))
    assert float(jnp.max(jnp.abs(out_t - ref_out))) < 5e-3
    assert float(jnp.max(jnp.abs(hn_t - ref_hn))) < 5e-3

    print("KERNEL_OK")
</pallas_src>

<mosaic_0001>
module attributes {stable_mosaic.version = 11 : i64} {
  func.func @kernel(%arg0: i32, %arg1: memref<8x128xf32, #tpu.memory_space<vmem>>, %arg2: memref<64x128xf32, #tpu.memory_space<vmem>>, %arg3: memref<128x128xf32, #tpu.memory_space<vmem>>, %arg4: memref<128x128xf32, #tpu.memory_space<vmem>>, %arg5: memref<1x128xf32, #tpu.memory_space<vmem>>, %arg6: memref<64x128xf32, #tpu.memory_space<vmem>>, %arg7: memref<8x128xf32, #tpu.memory_space<vmem>>, %arg8: memref<8x128xf32, #tpu.memory_space<vmem>>, %arg9: memref<128x128xf32, #tpu.memory_space<vmem>>) attributes {dimension_semantics = [#tpu.dimension_semantics<arbitrary>], iteration_bounds = array<i64: 2>, scalar_prefetch = 0 : i64, scratch_operands = 2 : i64, tpu.core_type = #tpu.core_type<tc>, window_params = [{pipeline_mode = #tpu.pipeline_mode<synchronous>, transform_indices = @transform_0, window_bounds = array<i64: 8, 128>}, {transform_indices = @transform_1, window_bounds = array<i64: 64, 128>}, {pipeline_mode = #tpu.pipeline_mode<synchronous>, transform_indices = @transform_2, window_bounds = array<i64: 128, 128>}, {pipeline_mode = #tpu.pipeline_mode<synchronous>, transform_indices = @transform_3, window_bounds = array<i64: 128, 128>}, {pipeline_mode = #tpu.pipeline_mode<synchronous>, transform_indices = @transform_4, window_bounds = array<i64: 1, 128>}, {transform_indices = @transform_5, window_bounds = array<i64: 64, 128>}, {pipeline_mode = #tpu.pipeline_mode<synchronous>, transform_indices = @transform_6, window_bounds = array<i64: 8, 128>}]} {
    %c2_i32 = arith.constant 2 : i32
    %c0_i32 = arith.constant 0 : i32
    %0 = arith.cmpi eq, %c2_i32, %c0_i32 : i32
    %c1_i32 = arith.constant 1 : i32
    %1 = arith.select %0, %c1_i32, %c2_i32 : i32
    %2 = arith.remsi %arg0, %1 : i32
    %c0_i32_0 = arith.constant 0 : i32
    %3 = arith.cmpi ne, %2, %c0_i32_0 : i32
    %c0_i32_1 = arith.constant 0 : i32
    %4 = arith.cmpi slt, %2, %c0_i32_1 : i32
    %c0_i32_2 = arith.constant 0 : i32
    %5 = arith.cmpi slt, %1, %c0_i32_2 : i32
    %6 = arith.xori %4, %5 : i1
    %7 = arith.andi %6, %3 : i1
    %8 = arith.addi %2, %1 : i32
    %9 = arith.select %7, %8, %2 : i32
    %c0_i32_3 = arith.constant 0 : i32
    %10 = arith.cmpi eq, %arg0, %c0_i32_3 : i32
    %11 = arith.extui %10 : i1 to i32
    %c0_i32_4 = arith.constant 0 : i32
    %12 = arith.cmpi ne, %11, %c0_i32_4 : i32
    scf.if %12 {
      %c0_71 = arith.constant 0 : index
      %c0_72 = arith.constant 0 : index
      %134 = vector.load %arg1[%c0_71, %c0_72] : memref<8x128xf32, #tpu.memory_space<vmem>>, vector<8x128xf32>
      %c0_73 = arith.constant 0 : index
      %c0_74 = arith.constant 0 : index
      %135 = vector.load %arg8[%c0_73, %c0_74] : memref<8x128xf32, #tpu.memory_space<vmem>>, vector<8x128xf32>
      tpu.vector_store %arg8[%c0_73, %c0_74], %134 {strides = array<i32>} : memref<8x128xf32, #tpu.memory_space<vmem>>, vector<8x128xf32>,
      %cst_75 = arith.constant 0.000000e+00 : f32
      %136 = vector.broadcast %cst_75 : f32 to vector<128x128xf32>
      %c0_76 = arith.constant 0 : index
      %c0_77 = arith.constant 0 : index
      %137 = vector.load %arg9[%c0_76, %c0_77] : memref<128x128xf32, #tpu.memory_space<vmem>>, vector<128x128xf32>
      tpu.vector_store %arg9[%c0_76, %c0_77], %136 {strides = array<i32>} : memref<128x128xf32, #tpu.memory_space<vmem>>, vector<128x128xf32>,
      %c0_78 = arith.constant 0 : index
      %c0_79 = arith.constant 0 : index
      %138 = vector.load %arg1[%c0_78, %c0_79] : memref<8x128xf32, #tpu.memory_space<vmem>>, vector<8x128xf32>
      %c0_80 = arith.constant 0 : index
      %c0_81 = arith.constant 0 : index
      %139 = vector.load %arg7[%c0_80, %c0_81] : memref<8x128xf32, #tpu.memory_space<vmem>>, vector<8x128xf32>
      tpu.vector_store %arg7[%c0_80, %c0_81], %138 {strides = array<i32>} : memref<8x128xf32, #tpu.memory_space<vmem>>, vector<8x128xf32>,
    } else {
    }
    %c1_i32_5 = arith.constant 1 : i32
    %13 = arith.subi %c1_i32_5, %9 : i32
    %c64_i32 = arith.constant 64 : i32
    %14 = arith.muli %13, %c64_i32 : i32
    %15 = tpu.assume_multiple %14, 64 : i32
    %16 = arith.index_cast %15 : i32 to index
    %c0 = arith.constant 0 : index
    %17 = vector.load %arg9[%16, %c0] : memref<128x128xf32, #tpu.memory_space<vmem>>, vector<64x128xf32>
    %c0_6 = arith.constant 0 : index
    %c0_7 = arith.constant 0 : index
    %18 = vector.load %arg4[%c0_6, %c0_7] : memref<128x128xf32, #tpu.memory_space<vmem>>, vector<128x128xf32>
    %cst = arith.constant dense<0.000000e+00> : vector<64x128xf32>
    %19 = tpu.matmul %17, %18, %cst {dimension_numbers = #tpu.dot_dimension_numbers<[1], [0], [0], [1], [0, 0, 1, 1], [], []>, precision = #tpu.contract_precision<fp32>} : vector<64x128xf32>, vector<128x128xf32>, vector<64x128xf32> -> vector<64x128xf32>
    %c0_8 = arith.constant 0 : index
    %c0_9 = arith.constant 0 : index
    %20 = vector.load %arg5[%c0_8, %c0_9] : memref<1x128xf32, #tpu.memory_space<vmem>>, vector<1x128xf32>
    %21 = vector.broadcast %20 : vector<1x128xf32> to vector<64x128xf32>
    %22 = arith.addf %19, %21 : vector<64x128xf32>
    %c0_10 = arith.constant 0 : index
    %c0_11 = arith.constant 0 : index
    %23 = vector.load %arg6[%c0_10, %c0_11] : memref<64x128xf32, #tpu.memory_space<vmem>>, vector<64x128xf32>
    tpu.vector_store %arg6[%c0_10, %c0_11], %22 {strides = array<i32>} : memref<64x128xf32, #tpu.memory_space<vmem>>, vector<64x128xf32>,
    %c0_12 = arith.constant 0 : index
    %c0_13 = arith.constant 0 : index
    %24 = vector.load %arg3[%c0_12, %c0_13] : memref<128x128xf32, #tpu.memory_space<vmem>>, vector<128x128xf32>
    %c0_14 = arith.constant 0 : index
    %c0_15 = arith.constant 0 : index
    %25 = vector.load %arg8[%c0_14, %c0_15] : memref<8x128xf32, #tpu.memory_space<vmem>>, vector<8x128xf32>
    %c0_i32_16 = arith.constant 0 : i32
    %c8_i32 = arith.constant 8 : i32
    %26 = arith.muli %c0_i32_16, %c8_i32 : i32
    %27 = tpu.assume_multiple %26, 8 : i32
    %28 = arith.index_cast %27 : i32 to index
    %c0_17 = arith.constant 0 : index
    %29 = vector.load %arg2[%28, %c0_17] : memref<64x128xf32, #tpu.memory_space<vmem>>, vector<8x128xf32>
    %cst_18 = arith.constant dense<0.000000e+00> : vector<8x128xf32>
    %30 = tpu.matmul %25, %24, %cst_18 {dimension_numbers = #tpu.dot_dimension_numbers<[1], [0], [0], [1], [0, 0, 1, 1], [], []>, precision = #tpu.contract_precision<fp32>} : vector<8x128xf32>, vector<128x128xf32>, vector<8x128xf32> -> vector<8x128xf32>
    %31 = arith.addf %29, %30 : vector<8x128xf32>
    %32 = math.tanh %31 : vector<8x128xf32>
    %c64_i32_19 = arith.constant 64 : i32
    %33 = arith.muli %9, %c64_i32_19 : i32
    %c8_i32_20 = arith.constant 8 : i32
    %34 = arith.muli %c0_i32_16, %c8_i32_20 : i32
    %35 = arith.addi %33, %34 : i32
    %36 = tpu.assume_multiple %35, 8 : i32
    %37 = arith.index_cast %36 : i32 to index
    %c0_21 = arith.constant 0 : index
    %38 = vector.load %arg9[%37, %c0_21] : memref<128x128xf32, #tpu.memory_space<vmem>>, vector<8x128xf32>
    tpu.vector_store %arg9[%37, %c0_21], %32 {strides = array<i32>} : memref<128x128xf32, #tpu.memory_space<vmem>>, vector<8x128xf32>,
    %c1_i32_22 = arith.constant 1 : i32
    %c8_i32_23 = arith.constant 8 : i32
    %39 = arith.muli %c1_i32_22, %c8_i32_23 : i32
    %40 = tpu.assume_multiple %39, 8 : i32
    %41 = arith.index_cast %40 : i32 to index
    %c0_24 = arith.constant 0 : index
    %42 = vector.load %arg2[%41, %c0_24] : memref<64x128xf32, #tpu.memory_space<vmem>>, vector<8x128xf32>
    %cst_25 = arith.constant dense<0.000000e+00> : vector<8x128xf32>
    %43 = tpu.matmul %32, %24, %cst_25 {dimension_numbers = #tpu.dot_dimension_numbers<[1], [0], [0], [1], [0, 0, 1, 1], [], []>, precision = #tpu.contract_precision<fp32>} : vector<8x128xf32>, vector<128x128xf32>, vector<8x128xf32> -> vector<8x128xf32>
    %44 = arith.addf %42, %43 : vector<8x128xf32>
    %45 = math.tanh %44 : vector<8x128xf32>
    %c64_i32_26 = arith.constant 64 : i32
    %46 = arith.muli %9, %c64_i32_26 : i32
    %c8_i32_27 = arith.constant 8 : i32
    %47 = arith.muli %c1_i32_22, %c8_i32_27 : i32
    %48 = arith.addi %46, %47 : i32
    %49 = tpu.assume_multiple %48, 8 : i32
    %50 = arith.index_cast %49 : i32 to index
    %c0_28 = arith.constant 0 : index
    %51 = vector.load %arg9[%50, %c0_28] : memref<128x128xf32, #tpu.memory_space<vmem>>, vector<8x128xf32>
    tpu.vector_store %arg9[%50, %c0_28], %45 {strides = array<i32>} : memref<128x128xf32, #tpu.memory_space<vmem>>, vector<8x128xf32>,
    %c2_i32_29 = arith.constant 2 : i32
    %c8_i32_30 = arith.constant 8 : i32
    %52 = arith.muli %c2_i32_29, %c8_i32_30 : i32
    %53 = tpu.assume_multiple %52, 8 : i32
    %54 = arith.index_cast %53 : i32 to index
    %c0_31 = arith.constant 0 : index
    %55 = vector.load %arg2[%54, %c0_31] : memref<64x128xf32, #tpu.memory_space<vmem>>, vector<8x128xf32>
    %cst_32 = arith.constant dense<0.000000e+00> : vector<8x128xf32>
    %56 = tpu.matmul %45, %24, %cst_32 {dimension_numbers = #tpu.dot_dimension_numbers<[1], [0], [0], [1], [0, 0, 1, 1], [], []>, precision = #tpu.contract_precision<fp32>} : vector<8x128xf32>, vector<128x128xf32>, vector<8x128xf32> -> vector<8x128xf32>
    %57 = arith.addf %55, %56 : vector<8x128xf32>
    %58 = math.tanh %57 : vector<8x128xf32>
    %c64_i32_33 = arith.constant 64 : i32
    %59 = arith.muli %9, %c64_i32_33 : i32
    %c8_i32_34 = arith.constant 8 : i32
    %60 = arith.muli %c2_i32_29, %c8_i32_34 : i32
    %61 = arith.addi %59, %60 : i32
    %62 = tpu.assume_multiple %61, 8 : i32
    %63 = arith.index_cast %62 : i32 to index
    %c0_35 = arith.constant 0 : index
    %64 = vector.load %arg9[%63, %c0_35] : memref<128x128xf32, #tpu.memory_space<vmem>>, vector<8x128xf32>
    tpu.vector_store %arg9[%63, %c0_35], %58 {strides = array<i32>} : memref<128x128xf32, #tpu.memory_space<vmem>>, vector<8x128xf32>,
    %c3_i32 = arith.constant 3 : i32
    %c8_i32_36 = arith.constant 8 : i32
    %65 = arith.muli %c3_i32, %c8_i32_36 : i32
    %66 = tpu.assume_multiple %65, 8 : i32
    %67 = arith.index_cast %66 : i32 to index
    %c0_37 = arith.constant 0 : index
    %68 = vector.load %arg2[%67, %c0_37] : memref<64x128xf32, #tpu.memory_space<vmem>>, vector<8x128xf32>
    %cst_38 = arith.constant dense<0.000000e+00> : vector<8x128xf32>
    %69 = tpu.matmul %58, %24, %cst_38 {dimension_numbers = #tpu.dot_dimension_numbers<[1], [0], [0], [1], [0, 0, 1, 1], [], []>, precision = #tpu.contract_precision<fp32>} : vector<8x128xf32>, vector<128x128xf32>, vector<8x128xf32> -> vector<8x128xf32>
    %70 = arith.addf %68, %69 : vector<8x128xf32>
    %71 = math.tanh %70 : vector<8x128xf32>
    %c64_i32_39 = arith.constant 64 : i32
    %72 = arith.muli %9, %c64_i32_39 : i32
    %c8_i32_40 = arith.constant 8 : i32
    %73 = arith.muli %c3_i32, %c8_i32_40 : i32
    %74 = arith.addi %72, %73 : i32
    %75 = tpu.assume_multiple %74, 8 : i32
    %76 = arith.index_cast %75 : i32 to index
    %c0_41 = arith.constant 0 : index
    %77 = vector.load %arg9[%76, %c0_41] : memref<128x128xf32, #tpu.memory_space<vmem>>, vector<8x128xf32>
    tpu.vector_store %arg9[%76, %c0_41], %71 {strides = array<i32>} : memref<128x128xf32, #tpu.memory_space<vmem>>, vector<8x128xf32>,
    %c4_i32 = arith.constant 4 : i32
    %c8_i32_42 = arith.constant 8 : i32
    %78 = arith.muli %c4_i32, %c8_i32_42 : i32
    %79 = tpu.assume_multiple %78, 8 : i32
    %80 = arith.index_cast %79 : i32 to index
    %c0_43 = arith.constant 0 : index
    %81 = vector.load %arg2[%80, %c0_43] : memref<64x128xf32, #tpu.memory_space<vmem>>, vector<8x128xf32>
    %cst_44 = arith.constant dense<0.000000e+00> : vector<8x128xf32>
    %82 = tpu.matmul %71, %24, %cst_44 {dimension_numbers = #tpu.dot_dimension_numbers<[1], [0], [0], [1], [0, 0, 1, 1], [], []>, precision = #tpu.contract_precision<fp32>} : vector<8x128xf32>, vector<128x128xf32>, vector<8x128xf32> -> vector<8x128xf32>
    %83 = arith.addf %81, %82 : vector<8x128xf32>
    %84 = math.tanh %83 : vector<8x128xf32>
    %c64_i32_45 = arith.constant 64 : i32
    %85 = arith.muli %9, %c64_i32_45 : i32
    %c8_i32_46 = arith.constant 8 : i32
    %86 = arith.muli %c4_i32, %c8_i32_46 : i32
    %87 = arith.addi %85, %86 : i32
    %88 = tpu.assume_multiple %87, 8 : i32
    %89 = arith.index_cast %88 : i32 to index
    %c0_47 = arith.constant 0 : index
    %90 = vector.load %arg9[%89, %c0_47] : memref<128x128xf32, #tpu.memory_space<vmem>>, vector<8x128xf32>
    tpu.vector_store %arg9[%89, %c0_47], %84 {strides = array<i32>} : memref<128x128xf32, #tpu.memory_space<vmem>>, vector<8x128xf32>,
    %c5_i32 = arith.constant 5 : i32
    %c8_i32_48 = arith.constant 8 : i32
    %91 = arith.muli %c5_i32, %c8_i32_48 : i32
    %92 = tpu.assume_multiple %91, 8 : i32
    %93 = arith.index_cast %92 : i32 to index
    %c0_49 = arith.constant 0 : index
    %94 = vector.load %arg2[%93, %c0_49] : memref<64x128xf32, #tpu.memory_space<vmem>>, vector<8x128xf32>
    %cst_50 = arith.constant dense<0.000000e+00> : vector<8x128xf32>
    %95 = tpu.matmul %84, %24, %cst_50 {dimension_numbers = #tpu.dot_dimension_numbers<[1], [0], [0], [1], [0, 0, 1, 1], [], []>, precision = #tpu.contract_precision<fp32>} : vector<8x128xf32>, vector<128x128xf32>, vector<8x128xf32> -> vector<8x128xf32>
    %96 = arith.addf %94, %95 : vector<8x128xf32>
    %97 = math.tanh %96 : vector<8x128xf32>
    %c64_i32_51 = arith.constant 64 : i32
    %98 = arith.muli %9, %c64_i32_51 : i32
    %c8_i32_52 = arith.constant 8 : i32
    %99 = arith.muli %c5_i32, %c8_i32_52 : i32
    %100 = arith.addi %98, %99 : i32
    %101 = tpu.assume_multiple %100, 8 : i32
    %102 = arith.index_cast %101 : i32 to index
    %c0_53 = arith.constant 0 : index
    %103 = vector.load %arg9[%102, %c0_53] : memref<128x128xf32, #tpu.memory_space<vmem>>, vector<8x128xf32>
    tpu.vector_store %arg9[%102, %c0_53], %97 {strides = array<i32>} : memref<128x128xf32, #tpu.memory_space<vmem>>, vector<8x128xf32>,
    %c6_i32 = arith.constant 6 : i32
    %c8_i32_54 = arith.constant 8 : i32
    %104 = arith.muli %c6_i32, %c8_i32_54 : i32
    %105 = tpu.assume_multiple %104, 8 : i32
    %106 = arith.index_cast %105 : i32 to index
    %c0_55 = arith.constant 0 : index
    %107 = vector.load %arg2[%106, %c0_55] : memref<64x128xf32, #tpu.memory_space<vmem>>, vector<8x128xf32>
    %cst_56 = arith.constant dense<0.000000e+00> : vector<8x128xf32>
    %108 = tpu.matmul %97, %24, %cst_56 {dimension_numbers = #tpu.dot_dimension_numbers<[1], [0], [0], [1], [0, 0, 1, 1], [], []>, precision = #tpu.contract_precision<fp32>} : vector<8x128xf32>, vector<128x128xf32>, vector<8x128xf32> -> vector<8x128xf32>
    %109 = arith.addf %107, %108 : vector<8x128xf32>
    %110 = math.tanh %109 : vector<8x128xf32>
    %c64_i32_57 = arith.constant 64 : i32
    %111 = arith.muli %9, %c64_i32_57 : i32
    %c8_i32_58 = arith.constant 8 : i32
    %112 = arith.muli %c6_i32, %c8_i32_58 : i32
    %113 = arith.addi %111, %112 : i32
    %114 = tpu.assume_multiple %113, 8 : i32
    %115 = arith.index_cast %114 : i32 to index
    %c0_59 = arith.constant 0 : index
    %116 = vector.load %arg9[%115, %c0_59] : memref<128x128xf32, #tpu.memory_space<vmem>>, vector<8x128xf32>
    tpu.vector_store %arg9[%115, %c0_59], %110 {strides = array<i32>} : memref<128x128xf32, #tpu.memory_space<vmem>>, vector<8x128xf32>,
    %c7_i32 = arith.constant 7 : i32
    %c8_i32_60 = arith.constant 8 : i32
    %117 = arith.muli %c7_i32, %c8_i32_60 : i32
    %118 = tpu.assume_multiple %117, 8 : i32
    %119 = arith.index_cast %118 : i32 to index
    %c0_61 = arith.constant 0 : index
    %120 = vector.load %arg2[%119, %c0_61] : memref<64x128xf32, #tpu.memory_space<vmem>>, vector<8x128xf32>
    %cst_62 = arith.constant dense<0.000000e+00> : vector<8x128xf32>
    %121 = tpu.matmul %110, %24, %cst_62 {dimension_numbers = #tpu.dot_dimension_numbers<[1], [0], [0], [1], [0, 0, 1, 1], [], []>, precision = #tpu.contract_precision<fp32>} : vector<8x128xf32>, vector<128x128xf32>, vector<8x128xf32> -> vector<8x128xf32>
    %122 = arith.addf %120, %121 : vector<8x128xf32>
    %123 = math.tanh %122 : vector<8x128xf32>
    %c64_i32_63 = arith.constant 64 : i32
    %124 = arith.muli %9, %c64_i32_63 : i32
    %c8_i32_64 = arith.constant 8 : i32
    %125 = arith.muli %c7_i32, %c8_i32_64 : i32
    %126 = arith.addi %124, %125 : i32
    %127 = tpu.assume_multiple %126, 8 : i32
    %128 = arith.index_cast %127 : i32 to index
    %c0_65 = arith.constant 0 : index
    %129 = vector.load %arg9[%128, %c0_65] : memref<128x128xf32, #tpu.memory_space<vmem>>, vector<8x128xf32>
    tpu.vector_store %arg9[%128, %c0_65], %123 {strides = array<i32>} : memref<128x128xf32, #tpu.memory_space<vmem>>, vector<8x128xf32>,
    %c8_i32_66 = arith.constant 8 : i32
    %c0_67 = arith.constant 0 : index
    %c0_68 = arith.constant 0 : index
    %130 = vector.load %arg8[%c0_67, %c0_68] : memref<8x128xf32, #tpu.memory_space<vmem>>, vector<8x128xf32>
    tpu.vector_store %arg8[%c0_67, %c0_68], %123 {strides = array<i32>} : memref<8x128xf32, #tpu.memory_space<vmem>>, vector<8x128xf32>,
    %c0_i32_69 = arith.constant 0 : i32
    %131 = arith.cmpi eq, %arg0, %c0_i32_69 : i32
    %132 = arith.extui %131 : i1 to i32
    %c0_i32_70 = arith.constant 0 : i32
    %133 = arith.cmpi ne, %132, %c0_i32_70 : i32
    scf.if %133 {
      %c0_71 = arith.constant 0 : index
      %c0_72 = arith.constant 0 : index
      %134 = vector.load %arg7[%c0_71, %c0_72] : memref<8x128xf32, #tpu.memory_space<vmem>>, vector<8x128xf32>
      tpu.vector_store %arg7[%c0_71, %c0_72], %123 {strides = array<i32>} : memref<8x128xf32, #tpu.memory_space<vmem>>, vector<8x128xf32>,
    } else {
    }
    return
  }
  func.func @transform_0(%arg0: i32) -> (i32, i32) {
    %c0_i32 = arith.constant 0 : i32
    %c0_i32_0 = arith.constant 0 : i32
    %c0_i32_1 = arith.constant 0 : i32
    return %c0_i32, %c0_i32_0 : i32, i32
  }
  func.func @transform_1(%arg0: i32) -> (i32, i32) {
    %c0_i32 = arith.constant 0 : i32
    %c0_i32_0 = arith.constant 0 : i32
    return %arg0, %c0_i32 : i32, i32
  }
  func.func @transform_2(%arg0: i32) -> (i32, i32) {
    %c0_i32 = arith.constant 0 : i32
    %c0_i32_0 = arith.constant 0 : i32
    %c0_i32_1 = arith.constant 0 : i32
    return %c0_i32, %c0_i32_0 : i32, i32
  }
  func.func @transform_3(%arg0: i32) -> (i32, i32) {
    %c0_i32 = arith.constant 0 : i32
    %c0_i32_0 = arith.constant 0 : i32
    %c0_i32_1 = arith.constant 0 : i32
    return %c0_i32, %c0_i32_0 : i32, i32
  }
  func.func @transform_4(%arg0: i32) -> (i32, i32) {
    %c0_i32 = arith.constant 0 : i32
    %c0_i32_0 = arith.constant 0 : i32
    %c0_i32_1 = arith.constant 0 : i32
    return %c0_i32, %c0_i32_0 : i32, i32
  }
  func.func @transform_5(%arg0: i32) -> (i32, i32) {
    %c0_i32 = arith.constant 0 : i32
    %c0_i32_0 = arith.constant 0 : i32
    return %arg0, %c0_i32 : i32, i32
  }
  func.func @transform_6(%arg0: i32) -> (i32, i32) {
    %c0_i32 = arith.constant 0 : i32
    %c0_i32_0 = arith.constant 0 : i32
    %c0_i32_1 = arith.constant 0 : i32
    return %c0_i32, %c0_i32_0 : i32, i32
  }
}

</mosaic_0001>

<bundles_post_ra>
// kernel: tpu_custom_call.1
= control target key start
LH: loop header
LB: loop body
LE: loop exit
PB: predicated region body
PF: predicated region fallthrough
CT: control target
= control target key end

     0   :  { %12 = vsyncpa [#allocation5], 0  ;;  %s5946_s0 = inlined_call_operand.hbm [shape: f32[8,128], index: 0, kind: input, shape index: {}]   ;;  %s5947_s1 = inlined_call_operand.hbm [shape: f32[128,128], index: 1, kind: input, shape index: {}]   ;;  %s5948_s2 = inlined_call_operand.hbm [shape: f32[128,128], index: 2, kind: input, shape index: {}]   ;;  %s5949_s3 = inlined_call_operand.hbm [shape: f32[128,128], index: 3, kind: input, shape index: {}]   ;;  %s5950_s4 = inlined_call_operand.vmem [shape: f32[1,128], index: 4, kind: input, shape index: {}]   ;;  %s5951_s5 = inlined_call_operand.hbm [shape: f32[128,128], index: 5, kind: output, shape index: {0}]   ;;  %s5952_s6 = inlined_call_operand.hbm [shape: f32[8,128], index: 6, kind: output, shape index: {1}]  }
   0x1   :  { %13 = vsyncpa [#allocation8], 0 }
   0x2   :  { %15 = vsyncpa [#allocation8 + $0x1], 0 }
   0x3   :  { %16 = vsyncpa [#allocation11], 0 }
   0x4   :  { %17 = vsyncpa [#allocation6], 0 }
   0x5   :  { %19 = vsyncpa [#allocation6 + $0x1], 0 }
   0x6   :  { %20 = vsyncpa [#allocation14], 0  ;;  %s4362_s21 = smov 0   ;;  %s4364_s22 = smov 0  }
   0x7   :  { %s4366_s23 = smov 0   ;;  %s4368_s24 = smov 0  }
   0x8 LB: > { %s4383_s25 = sadd.s32 4294967295, %s4316_s24   ;;  %s3928_s26 = sadd.s32 4294967294, %s4316_s24   ;;  %s4316_s24 = sphi %s4368_s24, %s6231_s24   ;;  %s4312_s23 = sphi %s4366_s23, %s6230_s23   ;;  %s4308_s22 = sphi %s4364_s22, %s6229_s22   ;;  %s4304_s21 = sphi %s4362_s21, %s6228_s21  }
   0x9   : > { %p67_p0 = scmp.ne.s32.totalorder %s4308_s22, %s4304_s21  ;;  %p68_p1 = scmp.eq.s32.totalorder %s4383_s25, 0 }
   0xa   : > { %p5955_p2 = scmp.eq.s32.totalorder %s4383_s25, 1  ;;  %p160_p3 = scmp.eq.s32.totalorder %s3928_s26, 1 }
   0xb   : > { %p4392_p4 = por %p68_p1, %p67_p0  ;;  %p3929_p5 = scmp.ge.s32.totalorder %s4316_s24, 1 }
   0xc   : > { %p4397_p6 = por %p160_p3, %p67_p0  ;;  %p188_p7 = scmp.lt.s32.totalorder %s4316_s24, 3 }
   0xd   : > { %s211_s7 = sshll.u32 %s5948_s2, 4  ;;  %s4318_s9 = smov [#allocation9]   ;;  %s212_s7 = int_to_ptr.hbm [resolvable:$true] %s211_s7 }
   0xe   : > { %p4406_p9 = pnand %p3929_p5, %p188_p7  ;;  %s213_s10 = sshll.u32 %s4318_s9, 4  ;;  %s214_s10 = int_to_ptr.vmem [resolvable:$true] %s213_s10 }
   0xf   : > { %s200_s14 = sshll.u32 %s5946_s0, 4  ;;  %s5953_s15 = smov 128   ;;  %s201_s14 = int_to_ptr.hbm [resolvable:$true] %s200_s14 }
  0x10   : > { %p4000_p10 = pneg %p4406_p9  ;;  %s5954_s16 = smov 8  }
  0x11   : > { %s4321_s17 = smov [#allocation4]   ;;  %s225_s26 = sshll.u32 %s5949_s3, 4  ;;  %s226_s26 = int_to_ptr.hbm [resolvable:$true] %s225_s26 }
  0x12   : > { %p4414_p11 = pnand %p4000_p10, %p68_p1  ;;  %s202_s18 = sshll.u32 %s4321_s17, 4  ;;  %s203_s18 = int_to_ptr.vmem [resolvable:$true] %s202_s18 }
  0x13   : > { %s4322_s29 = smov [#allocation10]   ;;  %p61_p0 = scmp.ne.s32.totalorder %s4312_s23, %s4308_s22 }
  0x14   : > { %4006 = dma.hbm_to_vmem [thread:$0]  (!%p4414_p11), %s212_s7, 2048, %s214_s10, [#allocation8], %s5953_s15, %s5953_s15, %s5954_s16  }
  0x15   : > { %4003 = dma.hbm_to_vmem [thread:$0]  (!%p4414_p11), %s201_s14, 128, %s203_s18, [#allocation5]  }
  0x16   : > { %s227_s30 = sshll.u32 %s4322_s29, 4  ;;  %s4433_s7 = sadd.s32 1, %s4316_s24   ;;  %s228_s30 = int_to_ptr.vmem [resolvable:$true] %s227_s30 }
  0x17   : > { %4009 = dma.hbm_to_vmem [thread:$0]  (!%p4414_p11), %s226_s26, 2048, %s228_s30, [#allocation11], %s5953_s15, %s5953_s15, %s5954_s16  }
  0x18   : > { %s51_s9 = ssub.s32 %s4316_s24, %s4433_s7  ;;  %s54_s10 = sadd.s32 1, %s4312_s23 }
  0x19   : > { %p52_p13 = scmp.eq.s32.totalorder %s51_s9, 0  ;;  %p62_p3 = scmp.eq.s32.totalorder %s4316_s24, 0 }
  0x1a   : > { %p4021_p5 = scmp.lt.s32.totalorder %s4316_s24, 2  ;;  %p4452_p10 = por %p5955_p2, %p61_p0 }
  0x1b   : > { %s4448_s12 = scalar_select %p52_p13, %s4312_s23, %s54_s10  }
  0x1c   : > { %p63_p7 = por %p62_p3, %p61_p0  ;;  %s244_s11 = sand.u32 1, %s4316_s24  }
  0x1d   : > { %s246_s14 = sand.u32 1, %s4312_s23   ;;  %s3978_s18 = sshll.u32 %s4316_s24, 6 }
  0x1e   : > { %s3934_s17 = sshll.u32 %s246_s14, 6  ;;  %s253_s26 = scalar_lea.hbm %s5947_s1, %s3978_s18 }
  0x1f   : > { %s248_s29 = scalar_lea.vmem [#allocation7], %s3934_s17  ;;  %s254_s9 = sshll.u32 %s253_s26, 4  ;;  %s255_s9 = int_to_ptr.hbm [resolvable:$true] %s254_s9 }
  0x20   : > { %s256_s30 = sshll.u32 %s248_s29, 4  ;;  %p4464_p11 = pnand %p4021_p5, %p63_p7  ;;  %s257_s30 = int_to_ptr.vmem [resolvable:$true] %s256_s30 }
  0x21   : > { %s245_s15 = scalar_lea.sflag [#allocation8], %s244_s11  ;;  %s4176_s16 = sshra.s32 %s255_s9, 4  ;;  %s4177_s16 = int_to_ptr.hbm [resolvable:$true] %s4176_s16 }
  0x22   : > { %s4178_s14 = scalar_lea.hbm %s4177_s16, 64  ;;  %p4180_p0 = pneg %p4464_p11 }
  0x23   : > { %p4179_p13 = scmp.ne.s32.totalorder %s4177_s16, %s4178_s14  ;;  %s4183_s19 = scalar_lea.hbm %s5947_s1, 128 }
  0x24   : > { %p4184_p5 = scmp.lt.s32.totalorder %s4177_s16, %s5947_s1  ;;  %p4185_p7 = scmp.lt.s32.totalorder %s4183_s19, %s4178_s14 }
  0x25   : > { %p4181_p3 = pnand %p4180_p0, %p4179_p13 }
  0x26   : > { %p4186_p2 = por %p4185_p7, %p4184_p5 }
  0x27   : > { %p4182_p12 = pneg %p4181_p3 }
  0x29   : > { %p4187_p8 = pnand %p4186_p2, %p4182_p12 }
  0x2b   : > { %4190 = shalt.err (!%p4187_p8)
}
  0x2c   : > { %s6059_s11 = smov 8   ;;  %s6060_s29 = smov 128  }
  0x2d   : > { %4013 = dma.hbm_to_vmem [thread:$0]  (!%p4464_p11), %s255_s9, 1024, %s257_s30, %s245_s15, %s6060_s29, %s6060_s29, %s6059_s11  }
  0x2e   : > { %268 = sbr.rel (%p4406_p9) target bundleno = 1546 (0x60a), region = 40 }
  0x33   : > { %4279 = dma.done.wait (%p68_p1), [#allocation5], 128  }
  0x34   : > { %4281 = vsyncadd (%p68_p1), [#allocation5], 4294967168  ;;  %s275_s16 = sand.u32 1, %s4383_s25   ;;  %s277_s14 = sand.u32 1, %s4308_s22  }
  0x35   : > { %s3939_s10 = sshll.u32 %s277_s14, 6  ;;  %s276_s17 = scalar_lea.sflag [#allocation8], %s275_s16 }
  0x36   : > { %s4491_s18 = scalar_lea.vmem [#allocation7], %s3939_s10 }
  0x37   : > { %4283 = dma.done.wait (%p4392_p4), %s276_s17, 1024  }
  0x38   : > { %4285 = vsyncadd (%p4392_p4), %s276_s17, 4294966272 }
  0x39   : > { %4287 = dma.done.wait (%p68_p1), [#allocation8], 2048  }
  0x3a   : > { %4289 = vsyncadd (%p68_p1), [#allocation8], 4294965248 }
  0x3b   : > { %4291 = dma.done.wait (%p68_p1), [#allocation11], 2048  }
  0x3c   : > { %4293 = vsyncadd (%p68_p1), [#allocation11], 4294965248  ;;  %p321_p2 = scmp.lt.s32.totalorder %s4383_s25, 0  ;;  %s322_s8 = ssub.s32 0, %s4383_s25 }
  0x3d   : > { %s3943_s15 = smin.u32 %s4383_s25, %s322_s8  ;;  %s4510_s19 = scalar_lea.vmem [#allocation12], %s3939_s10 }
  0x3e   : > { %s324_s27 = sand.u32 1, %s3943_s15   ;;  %p6061_p8 = scmp.ne.s32.totalorder %s4383_s25, 0 }
  0x3f   : > { %s325_s30 = ssub.s32 0, %s324_s27 }
  0x40   : > { %s6233_s30 = smov (!%p321_p2, %s325_s30), %s324_s27  ;;  %336 = sbr.rel (%p6061_p8) target bundleno = 88 (0x58), region = 60 }
  0x41   : > { %p3945_p4 = scmp.lt.s32.totalorder %s6233_s30, 0  ;;  %s331_s9 = sadd.s32 2, %s6233_s30 }
  0x43   : > { %s6235_s9 = smov (!%p3945_p4, %s331_s9), %s6233_s30 }
  0x45   : > { %v337_v0 = vld [vmem:[#allocation4] sm:$0xff]  ;;  %v4323_v1 = vmov 0.0  }
  0x46   : > { %338 = vst [vmem:[#allocation2] sm:$0xff] %v337_v0 }
  0x47   : > { %339 = vst [vmem:[#allocation3] sm:$0xff] %v4323_v1 }
  0x48   : > { %340 = vst [vmem:[#allocation3 + $0x8] sm:$0xff] %v4323_v1 }
  0x49   : > { %341 = vst [vmem:[#allocation3 + $0x10] sm:$0xff] %v4323_v1 }
  0x4a   : > { %342 = vst [vmem:[#allocation3 + $0x18] sm:$0xff] %v4323_v1 }
  0x4b   : > { %343 = vst [vmem:[#allocation3 + $0x20] sm:$0xff] %v4323_v1 }
  0x4c   : > { %344 = vst [vmem:[#allocation3 + $0x28] sm:$0xff] %v4323_v1 }
  0x4d   : > { %345 = vst [vmem:[#allocation3 + $0x30] sm:$0xff] %v4323_v1 }
  0x4e   : > { %346 = vst [vmem:[#allocation3 + $0x38] sm:$0xff] %v4323_v1 }
  0x4f   : > { %347 = vst [vmem:[#allocation3 + $0x40] sm:$0xff] %v4323_v1 }
  0x50   : > { %348 = vst [vmem:[#allocation3 + $0x48] sm:$0xff] %v4323_v1 }
  0x51   : > { %349 = vst [vmem:[#allocation3 + $0x50] sm:$0xff] %v4323_v1 }
  0x52   : > { %350 = vst [vmem:[#allocation3 + $0x58] sm:$0xff] %v4323_v1 }
  0x53   : > { %351 = vst [vmem:[#allocation3 + $0x60] sm:$0xff] %v4323_v1 }
  0x54   : > { %352 = vst [vmem:[#allocation3 + $0x68] sm:$0xff] %v4323_v1 }
  0x55   : > { %353 = vst [vmem:[#allocation3 + $0x70] sm:$0xff] %v4323_v1 }
  0x56   : > { %354 = vst [vmem:[#allocation3 + $0x78] sm:$0xff] %v4323_v1 }
  0x57   : > { %356 = vst [vmem:[#allocation13] sm:$0xff] %v337_v0 }
  0x58 PF: > { %v383_v2 = vld [vmem:[#allocation10 + $0x78] sm:$0xff]  ;;  %v382_v3 = vld [vmem:[#allocation10 + $0x70] sm:$0xff]  ;;  %v381_v4 = vld [vmem:[#allocation10 + $0x68] sm:$0xff]  ;;  %s357_s20 = ssub.s32 1, %s6235_s9  ;;  %s3948_s10 = sshll.u32 %s6235_s9, 6 }
  0x59   : > { %v4514_v5 = vand.u32 4294901760, %v383_v2  ;;  %v4516_v6 = vand.u32 4294901760, %v382_v3  ;;  %v4518_v7 = vand.u32 4294901760, %v381_v4  ;;  %v380_v8 = vld [vmem:[#allocation10 + $0x60] sm:$0xff]  ;;  %v379_v9 = vld [vmem:[#allocation10 + $0x58] sm:$0xff]  ;;  %v378_v10 = vld [vmem:[#allocation10 + $0x50] sm:$0xff] }
  0x5a   : > { %v4520_v11 = vand.u32 4294901760, %v380_v8  ;;  %v4522_v12 = vand.u32 4294901760, %v379_v9  ;;  %v4524_v13 = vand.u32 4294901760, %v378_v10  ;;  %v377_v14 = vld [vmem:[#allocation10 + $0x48] sm:$0xff]  ;;  %v376_v15 = vld [vmem:[#allocation10 + $0x40] sm:$0xff]  ;;  %v375_v20 = vld [vmem:[#allocation10 + $0x38] sm:$0xff] }
  0x5b   : > { %389 = vmatpush.msra.mxu0 %v4514_v5  ;;  %v4528_v16 = vsub.f32 %v383_v2, %v4514_v5  ;;  %v4531_v17 = vsub.f32 %v382_v3, %v4516_v6  ;;  %704 = vmatpush.msra.mxu3 %v4514_v5  ;;  %v4535_v18 = vsub.f32 %v381_v4, %v4518_v7  ;;  %v4537_v19 = vand.u32 4294901760, %v377_v14  ;;  %v374_v31 = vld [vmem:[#allocation10 + $0x30] sm:$0xff]  ;;  %v373_v38 = vld [vmem:[#allocation10 + $0x28] sm:$0xff]  ;;  %s4580_s26 = sshll.u32 %s357_s20, 6  ;;  %v372_v45 = vld [vmem:[#allocation10 + $0x20] sm:$0xff]  ;;  %s5339_s17 = scalar_lea.vmem [#allocation3], %s3948_s10 }
  0x5c   : > { %v4540_v21 = vsub.f32 %v380_v8, %v4520_v11  ;;  %v4543_v22 = vsub.f32 %v379_v9, %v4522_v12  ;;  %v4545_v23 = vand.u32 4294901760, %v376_v15  ;;  %v4548_v24 = vsub.f32 %v378_v10, %v4524_v13  ;;  %v371_v51 = vld [vmem:[#allocation10 + $0x18] sm:$0xff]  ;;  %v370_v57 = vld [vmem:[#allocation10 + $0x10] sm:$0xff]  ;;  %s4619_s11 = scalar_lea.vmem [#allocation3], %s4580_s26  ;;  %v369_v0 = vld [vmem:[#allocation10 + $0x8] sm:$0xff]  ;;  %p6223_p1 = scmp.ne.s32.totalorder %s4383_s25, 0 }
  0x5d   : > { %391 = vmatpush.msra.mxu0 %v4516_v6  ;;  %616 = vmatpush.msra.mxu2 %v4528_v16  ;;  %v487_v25 = vand.u32 4294901760, %v4528_v16  ;;  %v493_v26 = vand.u32 4294901760, %v4531_v17  ;;  %v499_v27 = vand.u32 4294901760, %v4535_v18  ;;  %v4558_v29 = vand.u32 4294901760, %v375_v20  ;;  %v360_v58 = vld [vmem:[%s4619_s11] sm:$0xff]  ;;  %v368_v10 = vld [vmem:[#allocation10] sm:$0xff] }
  0x5e   : > { %706 = vmatpush.msra.mxu3 %v4516_v6  ;;  %v505_v28 = vand.u32 4294901760, %v4540_v21  ;;  %v4561_v30 = vsub.f32 %v377_v14, %v4537_v19  ;;  %v511_v35 = vand.u32 4294901760, %v4543_v22  ;;  %v517_v36 = vand.u32 4294901760, %v4548_v24 }
  0x5f   : > { %393 = vmatpush.msra.mxu0 %v4518_v7  ;;  %619 = vmatpush.msra.mxu2 %v4531_v17  ;;  %v488_v32 = vsub.f32 %v4528_v16, %v487_v25  ;;  %v494_v33 = vsub.f32 %v4531_v17, %v493_v26  ;;  %v500_v34 = vsub.f32 %v4535_v18, %v499_v27  ;;  %v4587_v42 = vand.u32 4294901760, %v374_v31 }
  0x60   : > { %708 = vmatpush.msra.mxu3 %v4518_v7  ;;  %v4578_v37 = vsub.f32 %v376_v15, %v4545_v23  ;;  %v506_v41 = vsub.f32 %v4540_v21, %v505_v28  ;;  %v523_v43 = vand.u32 4294901760, %v4561_v30  ;;  %v4592_v44 = vsub.f32 %v375_v20, %v4558_v29 }
  0x61   : > { %395 = vmatpush.msra.mxu0 %v4520_v11  ;;  %v489_v39 = vand.u32 4294901760, %v488_v32  ;;  %622 = vmatpush.msra.mxu2 %v4535_v18  ;;  %v495_v40 = vand.u32 4294901760, %v494_v33  ;;  %v501_v46 = vand.u32 4294901760, %v500_v34  ;;  %v512_v47 = vsub.f32 %v4543_v22, %v511_v35  ;;  %v361_v32 = vld [vmem:[%s4619_s11 + $0x8] sm:$0xff] }
  0x62   : > { %710 = vmatpush.msra.mxu3 %v4520_v11  ;;  %v4598_v48 = vand.u32 4294901760, %v373_v38  ;;  %v518_v49 = vsub.f32 %v4548_v24, %v517_v36  ;;  %v529_v50 = vand.u32 4294901760, %v4578_v37  ;;  %v507_v52 = vand.u32 4294901760, %v506_v41  ;;  %v969_v18 = vld [vmem:[#allocation9 + $0x78] sm:$0xff] }
  0x63   : > { %397 = vmatpush.msra.mxu0 %v4522_v12  ;;  %490 = vmatpush.msra.mxu1 %v489_v39  ;;  %v4607_v53 = vand.u32 4294901760, %v372_v45  ;;  %v4610_v54 = vsub.f32 %v374_v31, %v4587_v42  ;;  %v524_v55 = vsub.f32 %v4561_v30, %v523_v43  ;;  %v535_v56 = vand.u32 4294901760, %v4592_v44 }
  0x64   : > { %625 = vmatpush.msra.mxu2 %v4540_v21  ;;  %712 = vmatpush.msra.mxu3 %v4522_v12  ;;  %v513_v59 = vand.u32 4294901760, %v512_v47  ;;  %v4623_v60 = vand.u32 4294901760, %v371_v51  ;;  %v4626_v61 = vsub.f32 %v373_v38, %v4598_v48  ;;  %v519_v62 = vand.u32 4294901760, %v518_v49  ;;  %v365_v21 = vld [vmem:[%s4619_s11 + $0x28] sm:$0xff] }
  0x65   : > { %399 = vmatpush.msra.mxu0 %v4524_v13  ;;  %496 = vmatpush.msra.mxu1 %v495_v40  ;;  %v530_v63 = vsub.f32 %v4578_v37, %v529_v50  ;;  %v4634_v1 = vand.u32 4294901760, %v370_v57  ;;  %v541_v2 = vand.u32 4294901760, %v4610_v54  ;;  %v4638_v3 = vsub.f32 %v372_v45, %v4607_v53 }
  0x66   : > { %628 = vmatpush.msra.mxu2 %v4543_v22  ;;  %714 = vmatpush.msra.mxu3 %v4524_v13  ;;  %v4640_v4 = vand.u32 4294901760, %v360_v58  ;;  %v525_v8 = vand.u32 4294901760, %v524_v55  ;;  %v536_v9 = vsub.f32 %v4592_v44, %v535_v56  ;;  %v4648_v14 = vand.u32 4294901760, %v369_v0 }
  0x67   : > { %401 = vmatpush.msra.mxu0 %v4537_v19  ;;  %502 = vmatpush.msra.mxu1 %v501_v46  ;;  %v547_v15 = vand.u32 4294901760, %v4626_v61  ;;  %v4652_v20 = vsub.f32 %v371_v51, %v4623_v60  ;;  %v531_v33 = vand.u32 4294901760, %v530_v63  ;;  %v542_v34 = vsub.f32 %v4610_v54, %v541_v2 }
  0x68   : > { %631 = vmatpush.msra.mxu2 %v4548_v24  ;;  %716 = vmatpush.msra.mxu3 %v4537_v19  ;;  %v4655_v31 = vsub.f32 %v360_v58, %v4640_v4  ;;  %v4664_v38 = vand.u32 4294901760, %v368_v10  ;;  %v553_v39 = vand.u32 4294901760, %v4638_v3  ;;  %v4668_v40 = vsub.f32 %v370_v57, %v4634_v1 }
  0x69   : > { %403 = vmatpush.msra.mxu0 %v4545_v23  ;;  %508 = vmatpush.msra.mxu1 %v507_v52  ;;  %v4673_v45 = vand.u32 4294901760, %v361_v32  ;;  %v537_v46 = vand.u32 4294901760, %v536_v9  ;;  %v548_v47 = vsub.f32 %v4626_v61, %v547_v15  ;;  %v5958_v49 = vand.u32 4294901760, %v4652_v20  ;;  %v362_v9 = vld [vmem:[%s4619_s11 + $0x10] sm:$0xff] }
  0x6a   : > { %634 = vmatpush.msra.mxu2 %v4561_v30  ;;  %718 = vmatpush.msra.mxu3 %v4545_v23  ;;  %v422_v41 = vand.u32 4294901760, %v4655_v31  ;;  %v4681_v51 = vsub.f32 %v369_v0, %v4648_v14  ;;  %v543_v52 = vand.u32 4294901760, %v542_v34  ;;  %v554_v55 = vsub.f32 %v4638_v3, %v553_v39 }
  0x6b   : > { %405 = vmatpush.msra.mxu0 %v4558_v29  ;;  %514 = vmatpush.msra.mxu1 %v513_v59  ;;  %v5956_v57 = vand.u32 4294901760, %v4668_v40  ;;  %v4691_v58 = vsub.f32 %v368_v10, %v4664_v38  ;;  %v549_v63 = vand.u32 4294901760, %v548_v47  ;;  %v560_v0 = vsub.f32 %v4652_v20, %v5958_v49  ;;  %v363_v49 = vld [vmem:[%s4619_s11 + $0x18] sm:$0xff] }
  0x6c   : > { %637 = vmatpush.msra.mxu2 %v4578_v37  ;;  %720 = vmatpush.msra.mxu3 %v4558_v29  ;;  %v423_v59 = vsub.f32 %v4655_v31, %v422_v41  ;;  %v555_v10 = vand.u32 4294901760, %v554_v55  ;;  %v4712_v47 = vand.u32 4294901760, %v362_v9 }
  0x6d   : > { %407 = vmatpush.msra.mxu0 %v4587_v42  ;;  %520 = vmatpush.msra.mxu1 %v519_v62  ;;  %v429_v62 = vsub.f32 %v361_v32, %v4673_v45  ;;  %v566_v32 = vsub.f32 %v4668_v40, %v5956_v57 }
  0x6e   : > { %640 = vmatpush.msra.mxu2 %v4592_v44  ;;  %722 = vmatpush.msra.mxu3 %v4587_v42  ;;  %v424_v34 = vand.u32 4294901760, %v423_v59 }
  0x6f   : > { %409 = vmatpush.msra.mxu0 %v4598_v48  ;;  %526 = vmatpush.msra.mxu1 %v525_v8  ;;  %v5957_v8 = vand.u32 4294901760, %v4681_v51  ;;  %v567_v59 = vand.u32 4294901760, %v566_v32 }
  0x70   : > { %643 = vmatpush.msra.mxu2 %v4610_v54  ;;  %724 = vmatpush.msra.mxu3 %v4598_v48 }
  0x71   : > { %411 = vmatpush.msra.mxu0 %v4607_v53  ;;  %532 = vmatpush.msra.mxu1 %v531_v33  ;;  %v5959_v33 = vand.u32 4294901760, %v4691_v58  ;;  %v572_v55 = vsub.f32 %v4681_v51, %v5957_v8 }
  0x72   : > { %646 = vmatpush.msra.mxu2 %v4626_v61  ;;  %726 = vmatpush.msra.mxu3 %v4607_v53 }
  0x73   : > { %413 = vmatpush.msra.mxu0 %v4623_v60  ;;  %538 = vmatpush.msra.mxu1 %v537_v46  ;;  %v430_v46 = vand.u32 4294901760, %v429_v62  ;;  %v578_v57 = vsub.f32 %v4691_v58, %v5959_v33  ;;  %v573_v8 = vand.u32 4294901760, %v572_v55  ;;  %v4732_v33 = vand.u32 4294901760, %v363_v49 }
  0x74   : > { %649 = vmatpush.msra.mxu2 %v4638_v3  ;;  %728 = vmatpush.msra.mxu3 %v4623_v60 }
  0x75   : > { %415 = vmatpush.msra.mxu0 %v4634_v1  ;;  %544 = vmatpush.msra.mxu1 %v543_v52  ;;  %v561_v52 = vand.u32 4294901760, %v560_v0  ;;  %v437_v0 = vsub.f32 %v362_v9, %v4712_v47  ;;  %v4738_v9 = vsub.f32 %v363_v49, %v4732_v33 }
  0x76   : > { %652 = vmatpush.msra.mxu2 %v4652_v20  ;;  %730 = vmatpush.msra.mxu3 %v4634_v1 }
  0x77   : > { %417 = vmatpush.msra.mxu0 %v4648_v14  ;;  %550 = vmatpush.msra.mxu1 %v549_v63  ;;  %v431_v63 = vsub.f32 %v429_v62, %v430_v46 }
  0x78   : > { %655 = vmatpush.msra.mxu2 %v4668_v40  ;;  %732 = vmatpush.msra.mxu3 %v4648_v14 }
  0x79   : > { %419 = vmatpush.msra.mxu0 %v4664_v38  ;;  %556 = vmatpush.msra.mxu1 %v555_v10  ;;  %v579_v10 = vand.u32 4294901760, %v578_v57  ;;  %v432_v32 = vand.u32 4294901760, %v431_v63  ;;  %v964_v63 = vld [vmem:[#allocation9 + $0x50] sm:$0xff] }
  0x7a   : > { %425 = vmatmul.f32.vlgmr.msra.gmra.mxu0 %v424_v34  ;;  %658 = vmatpush.msra.mxu2 %v4681_v51  ;;  %v438_v34 = vand.u32 4294901760, %v437_v0 }
  0x7b   : > { %562 = vmatpush.msra.mxu1 %v561_v52  ;;  %734 = vmatpush.msra.mxu3 %v4664_v38 }
  0x7c   : > { %661 = vmatpush.msra.mxu2 %v4691_v58  ;;  %738 = vmatmul.f32.vlgmr.msra.gmra.mxu3 %v422_v41  ;;  %v439_v41 = vsub.f32 %v437_v0, %v438_v34 }
  0x7d   : > { %568 = vmatpush.msra.mxu1 %v567_v59  ;;  %664 = vmatmul.f32.vlgmr.msra.gmra.mxu2 %v4655_v31  ;;  %v364_v31 = vld [vmem:[%s4619_s11 + $0x20] sm:$0xff] }
  0x7e   : > { %787 = vmatpush.msrb.mxu0 %v487_v25  ;;  %v4745_v16 = vand.u32 4294901760, %v364_v31  ;;  %v440_v17 = vand.u32 4294901760, %v439_v41  ;;  %v446_v25 = vand.u32 4294901760, %v4738_v9 }
  0x7f   : > { %574 = vmatpush.msra.mxu1 %v573_v8 }
  0x80   : > { %791 = vmatpush.msrb.mxu0 %v493_v26  ;;  %6062 = vst [vmem:[#allocation21_spill] sm:$0xff] %v4745_v16  ;;  %v4760_v26 = vand.u32 4294901760, %v969_v18 }
  0x81   : > { %580 = vmatpush.msra.mxu1 %v579_v10 }
  0x82   : > { %433 = vmatmul.f32.gmra.mxu0 %v432_v32  ;;  %582 = vmatmul.f32.vlgmr.msra.gmra.mxu1 %v4640_v4  ;;  %v4830_v32 = vand.u32 4294901760, %v964_v63 }
  0x83   : > { %882 = vmatpush.msrb.mxu1 %v4514_v5  ;;  %795 = vmatpush.msrb.mxu0 %v499_v27  ;;  %v4755_v5 = vsub.f32 %v364_v31, %v4745_v16 }
  0x84   : > { %744 = vmatmul.f32.gmra.mxu3 %v430_v46  ;;  %973 = vmatpush.msrb.mxu2 %v4760_v26 }
  0x85   : > { %669 = vmatmul.f32.gmra.mxu2 %v429_v62  ;;  %884 = vmatpush.msrb.mxu1 %v4516_v6  ;;  %v447_v6 = vsub.f32 %v4738_v9, %v446_v25  ;;  %v454_v27 = vand.u32 4294901760, %v4755_v5 }
  0x86   : > { %799 = vmatpush.msrb.mxu0 %v505_v28  ;;  %v4773_v28 = vand.u32 4294901760, %v365_v21 }
  0x87   : > { %886 = vmatpush.msrb.mxu1 %v4518_v7  ;;  %v968_v7 = vld [vmem:[#allocation9 + $0x70] sm:$0xff]  ;;  %v455_v62 = vsub.f32 %v4755_v5, %v454_v27 }
  0x88   : > { %803 = vmatpush.msrb.mxu0 %v511_v35  ;;  %v4769_v22 = vand.u32 4294901760, %v968_v7  ;;  %6063 = vst [vmem:[#allocation22_spill] sm:$0xff] %v4773_v28  ;;  %v448_v35 = vand.u32 4294901760, %v447_v6 }
  0x89   : > { %888 = vmatpush.msrb.mxu1 %v4520_v11  ;;  %v4767_v11 = vsub.f32 %v969_v18, %v4760_v26  ;;  %v961_v18 = vld [vmem:[#allocation9 + $0x38] sm:$0xff] }
  0x8a   : > { %441 = vmatmul.f32.gmra.mxu0 %v440_v17  ;;  %586 = vmatmul.f32.gmra.mxu1 %v4673_v45 }
  0x8b   : > { %890 = vmatpush.msrb.mxu1 %v4522_v12  ;;  %807 = vmatpush.msrb.mxu0 %v517_v36  ;;  %v967_v12 = vld [vmem:[#allocation9 + $0x68] sm:$0xff]  ;;  %v4778_v24 = vand.u32 4294901760, %v4767_v11  ;;  %v4782_v36 = vsub.f32 %v968_v7, %v4769_v22  ;;  %v4880_v7 = vand.u32 4294901760, %v961_v18 }
  0x8c   : > { %750 = vmatmul.f32.gmra.mxu3 %v438_v34  ;;  %975 = vmatpush.msrb.mxu2 %v4769_v22  ;;  %v4784_v49 = vand.u32 4294901760, %v967_v12  ;;  %v963_v34 = vld [vmem:[#allocation9 + $0x48] sm:$0xff] }
  0x8d   : > { %674 = vmatmul.f32.gmra.mxu2 %v437_v0  ;;  %892 = vmatpush.msrb.mxu1 %v4524_v13  ;;  %6064 = vst [vmem:[#allocation23_spill] sm:$0xff] %v4778_v24  ;;  %v966_v13 = vld [vmem:[#allocation9 + $0x60] sm:$0xff]  ;;  %v1016_v30 = vsub.f32 %v4767_v11, %v4778_v24  ;;  %v4845_v17 = vand.u32 4294901760, %v963_v34 }
  0x8e   : > { %811 = vmatpush.msrb.mxu0 %v523_v43  ;;  %v4792_v43 = vand.u32 4294901760, %v4782_v36  ;;  %977 = vmatpush.msrb.mxu2 %v4784_v49  ;;  %v4795_v57 = vand.u32 4294901760, %v966_v13  ;;  %v4805_v37 = vsub.f32 %v967_v12, %v4784_v49  ;;  %v367_v12 = vld [vmem:[%s4619_s11 + $0x38] sm:$0xff] }
  0x8f   : > { %894 = vmatpush.msrb.mxu1 %v4537_v19  ;;  %v4802_v19 = vsub.f32 %v365_v21, %v4773_v28  ;;  %v4808_v8 = vand.u32 4294901760, %v1016_v30  ;;  %v960_v30 = vld [vmem:[#allocation9 + $0x30] sm:$0xff] }
  0x90   : > { %815 = vmatpush.msrb.mxu0 %v529_v50  ;;  %6065 = vst [vmem:[#allocation24_spill] sm:$0xff] %v4792_v43  ;;  %v965_v50 = vld [vmem:[#allocation9 + $0x58] sm:$0xff]  ;;  %v1022_v46 = vsub.f32 %v4782_v36, %v4792_v43  ;;  %v4815_v55 = vsub.f32 %v966_v13, %v4795_v57  ;;  %v4822_v59 = vand.u32 4294901760, %v4805_v37  ;;  %979 = vmatpush.msrb.mxu2 %v4795_v57 }
  0x91   : > { %896 = vmatpush.msrb.mxu1 %v4545_v23  ;;  %6066 = vst [vmem:[#allocation25_spill] sm:$0xff] %v4808_v8  ;;  %v4812_v52 = vand.u32 4294901760, %v965_v50  ;;  %v366_v23 = vld [vmem:[%s4619_s11 + $0x30] sm:$0xff]  ;;  %1018 = vmatpush.msrb.mxu3 %v4808_v8 }
  0x92   : > { %449 = vmatmul.f32.gmra.mxu0 %v448_v35  ;;  %590 = vmatmul.f32.gmra.mxu1 %v4712_v47  ;;  %v4824_v0 = vand.u32 4294901760, %v1022_v46  ;;  %v4828_v10 = vand.u32 4294901760, %v4815_v55  ;;  %v4840_v41 = vand.u32 4294901760, %v366_v23  ;;  %v1028_v31 = vsub.f32 %v4805_v37, %v4822_v59 }
  0x93   : > { %819 = vmatpush.msrb.mxu0 %v535_v56  ;;  %898 = vmatpush.msrb.mxu1 %v4558_v29  ;;  %v4833_v44 = vsub.f32 %v965_v50, %v4812_v52  ;;  %v456_v29 = vand.u32 4294901760, %v455_v62  ;;  %v5960_v56 = vand.u32 4294901760, %v4802_v19  ;;  %v4899_v50 = vand.u32 4294901760, %v960_v30 }
  0x94   : > { %756 = vmatmul.f32.gmra.mxu3 %v446_v25  ;;  %6067 = vst [vmem:[#allocation26_spill] sm:$0xff] %v4824_v0  ;;  %981 = vmatpush.msrb.mxu2 %v4812_v52  ;;  %v4876_v6 = vsub.f32 %v366_v23, %v4840_v41  ;;  %v4878_v21 = vand.u32 4294901760, %v1028_v31 }
  0x95   : > { %6068 = vst [vmem:[#allocation27_spill] sm:$0xff] %v4833_v44  ;;  %679 = vmatmul.f32.gmra.mxu2 %v4738_v9  ;;  %823 = vmatpush.msrb.mxu0 %v541_v2  ;;  %v4848_v9 = vsub.f32 %v964_v63, %v4830_v32  ;;  %v4854_v54 = vand.u32 4294901760, %v4833_v44  ;;  %v1034_v2 = vsub.f32 %v4815_v55, %v4828_v10 }
  0x96   : > { %900 = vmatpush.msrb.mxu1 %v4587_v42  ;;  %v962_v42 = vld [vmem:[#allocation9 + $0x40] sm:$0xff]  ;;  %1024 = vmatpush.msrb.mxu3 %v4824_v0  ;;  %v463_v61 = vsub.f32 %v4802_v19, %v5960_v56  ;;  %6070 = vst [vmem:[#allocation29_spill] sm:$0xff] %v4878_v21  ;;  %v5961_v63 = vand.u32 4294901760, %v4876_v6  ;;  %v6083_v56 = vand.u32 4294901760, %v4691_v58 }
  0x97   : > { %6069 = vst [vmem:[#allocation28_spill] sm:$0xff] %v4848_v9  ;;  %827 = vmatpush.msrb.mxu0 %v547_v15  ;;  %v4860_v25 = vand.u32 4294901760, %v962_v42  ;;  %983 = vmatpush.msrb.mxu2 %v4830_v32  ;;  %v4869_v15 = vand.u32 4294901760, %v4848_v9  ;;  %v1040_v35 = vsub.f32 %v4833_v44, %v4854_v54  ;;  %v4896_v62 = vand.u32 4294901760, %v1034_v2 }
  0x98   : > { %902 = vmatpush.msrb.mxu1 %v4598_v48  ;;  %v4872_v48 = vsub.f32 %v963_v34, %v4845_v17  ;;  %v6074_v34 = vand.u32 4294901760, %v4668_v40  ;;  %1030 = vmatpush.msrb.mxu3 %v4878_v21  ;;  %v958_v40 = vld [vmem:[#allocation9 + $0x20] sm:$0xff] }
  0x99   : > { %831 = vmatpush.msrb.mxu0 %v553_v39  ;;  %v4883_v3 = vsub.f32 %v962_v42, %v4860_v25  ;;  %v6071_v39 = vand.u32 4294901760, %v4652_v20  ;;  %6072 = vst [vmem:[#allocation30_spill] sm:$0xff] %v4896_v62  ;;  %985 = vmatpush.msrb.mxu2 %v4845_v17  ;;  %v464_v20 = vand.u32 4294901760, %v463_v61  ;;  %v1046_v46 = vsub.f32 %v4848_v9, %v4869_v15 }
  0x9a   : > { %457 = vmatmul.f32.gmra.mxu0 %v456_v29  ;;  %594 = vmatmul.f32.gmra.mxu1 %v4732_v33  ;;  %v4892_v13 = vand.u32 4294901760, %v4872_v48  ;;  %v4912_v29 = vand.u32 4294901760, %v367_v12  ;;  %v4923_v31 = vand.u32 4294901760, %v1040_v35  ;;  %v6077_v61 = vand.u32 4294901760, %v4681_v51  ;;  %v957_v51 = vld [vmem:[#allocation9 + $0x18] sm:$0xff] }
  0x9b   : > { %904 = vmatpush.msrb.mxu1 %v4607_v53  ;;  %835 = vmatpush.msrb.mxu0 %v6071_v39  ;;  %v4902_v53 = vsub.f32 %v961_v18, %v4880_v7  ;;  %v4909_v23 = vand.u32 4294901760, %v4883_v3  ;;  %v4934_v18 = vand.u32 4294901760, %v958_v40 }
  0x9c   : > { %762 = vmatmul.f32.gmra.mxu3 %v454_v27  ;;  %v959_v27 = vld [vmem:[#allocation9 + $0x28] sm:$0xff]  ;;  %6076 = vst [vmem:[#allocation33_spill] sm:$0xff] %v4923_v31  ;;  %987 = vmatpush.msrb.mxu2 %v4860_v25  ;;  %v1052_v42 = vsub.f32 %v4872_v48, %v4892_v13 }
  0x9d   : > { %6073 = vst [vmem:[#allocation31_spill] sm:$0xff] %v4902_v53  ;;  %684 = vmatmul.f32.gmra.mxu2 %v4755_v5  ;;  %906 = vmatpush.msrb.mxu1 %v4623_v60  ;;  %v4917_v5 = vand.u32 4294901760, %v959_v27  ;;  %v4920_v60 = vsub.f32 %v960_v30, %v4899_v50  ;;  %v4929_v2 = vand.u32 4294901760, %v4902_v53  ;;  %v1058_v39 = vsub.f32 %v4883_v3, %v4909_v23 }
  0x9e   : > { %839 = vmatpush.msrb.mxu0 %v6074_v34  ;;  %1036 = vmatpush.msrb.mxu3 %v4896_v62  ;;  %v4955_v34 = vand.u32 4294901760, %v957_v51  ;;  %v6086_v62 = vand.u32 4294901760, %v4802_v19 }
  0x9f   : > { %6075 = vst [vmem:[#allocation32_spill] sm:$0xff] %v4920_v60  ;;  %908 = vmatpush.msrb.mxu1 %v4634_v1  ;;  %v4937_v1 = vand.u32 4294901760, %v1046_v46  ;;  %989 = vmatpush.msrb.mxu2 %v4880_v7  ;;  %v4943_v35 = vand.u32 4294901760, %v4920_v60  ;;  %v4946_v30 = vsub.f32 %v959_v27, %v4917_v5  ;;  %v4953_v46 = vsub.f32 %v367_v12, %v4912_v29  ;;  %v956_v12 = vld [vmem:[#allocation9 + $0x10] sm:$0xff] }
  0xa0   : > { %843 = vmatpush.msrb.mxu0 %v6077_v61  ;;  %6081 = vst [vmem:[#allocation37_spill] sm:$0xff] %v4955_v34  ;;  %v4958_v61 = vsub.f32 %v958_v40, %v4934_v18  ;;  %1042 = vmatpush.msrb.mxu3 %v4923_v31  ;;  %v1064_v27 = vsub.f32 %v4902_v53, %v4929_v2  ;;  %v4973_v40 = vand.u32 4294901760, %v956_v12 }
  0xa1   : > { %910 = vmatpush.msrb.mxu1 %v4648_v14  ;;  %6078 = vst [vmem:[#allocation34_spill] sm:$0xff] %v4937_v1  ;;  %v471_v14 = vsub.f32 %v4876_v6, %v5961_v63  ;;  %v4968_v63 = vand.u32 4294901760, %v4946_v30  ;;  %v4976_v58 = vsub.f32 %v957_v51, %v4955_v34  ;;  %991 = vmatpush.msrb.mxu2 %v4899_v50 }
  0xa2   : > { %6079 = vst [vmem:[#allocation35_spill] sm:$0xff] %v4943_v35  ;;  %465 = vmatmul.f32.gmra.mxu0 %v464_v20  ;;  %598 = vmatmul.f32.gmra.mxu1 %v4745_v16  ;;  %v4963_v20 = vand.u32 4294901760, %v1052_v42  ;;  %v1070_v42 = vsub.f32 %v4920_v60, %v4943_v35  ;;  %v4985_v31 = vand.u32 4294901760, %v4958_v61 }
  0xa3   : > { %6080 = vst [vmem:[#allocation36_spill] sm:$0xff] %v4946_v30  ;;  %847 = vmatpush.msrb.mxu0 %v6083_v56  ;;  %912 = vmatpush.msrb.mxu1 %v4664_v38  ;;  %v4980_v56 = vand.u32 4294901760, %v1058_v39  ;;  %v472_v21 = vand.u32 4294901760, %v471_v14  ;;  %v478_v38 = vand.u32 4294901760, %v4953_v46  ;;  %v4997_v39 = vand.u32 4294901760, %v1064_v27 }
  0xa4   : > { %6082 = vst [vmem:[#allocation38_spill] sm:$0xff] %v4958_v61  ;;  %768 = vmatmul.f32.gmra.mxu3 %v6086_v62  ;;  %v955_v62 = vld [vmem:[#allocation9 + $0x8] sm:$0xff]  ;;  %v1076_v14 = vsub.f32 %v4946_v30, %v4968_v63  ;;  %993 = vmatpush.msrb.mxu2 %v4917_v5  ;;  %v1082_v27 = vsub.f32 %v4958_v61, %v4985_v31 }
  0xa5   : > { %6084 = vst [vmem:[#allocation39_spill] sm:$0xff] %v4963_v20  ;;  %689 = vmatmul.f32.gmra.mxu2 %v4802_v19  ;;  %1048 = vmatpush.msrb.mxu3 %v4937_v1  ;;  %v4990_v51 = vand.u32 4294901760, %v955_v62  ;;  %v4993_v19 = vsub.f32 %v956_v12, %v4973_v40  ;;  %v5002_v1 = vand.u32 4294901760, %v4976_v58  ;;  %v5010_v12 = vand.u32 4294901760, %v1070_v42 }
  0xa6   : > { %6085 = vst [vmem:[#allocation40_spill] sm:$0xff] %v4968_v63  ;;  %1210 = vmatpush.msra.mxu0 %v4778_v24  ;;  %1277 = vmatpush.msra.mxu1 %v4760_v26  ;;  %v954_v24 = vld [vmem:[#allocation9] sm:$0xff]  ;;  %v5027_v42 = vand.u32 4294901760, %v1076_v14 }
  0xa7   : > { %6087 = vst [vmem:[#allocation41_spill] sm:$0xff] %v4973_v40  ;;  %1054 = vmatpush.msrb.mxu3 %v4963_v20  ;;  %v5006_v0 = vand.u32 4294901760, %v954_v24  ;;  %v5015_v20 = vand.u32 4294901760, %v4993_v19  ;;  %v5018_v8 = vsub.f32 %v955_v62, %v4990_v51  ;;  %995 = vmatpush.msrb.mxu2 %v4934_v18  ;;  %v1088_v16 = vsub.f32 %v4976_v58, %v5002_v1 }
  0xa8   : > { %6088 = vst [vmem:[#allocation42_spill] sm:$0xff] %v4976_v58  ;;  %1214 = vmatpush.msra.mxu0 %v4792_v43  ;;  %1279 = vmatpush.msra.mxu1 %v4769_v22  ;;  %v479_v43 = vsub.f32 %v4953_v46, %v478_v38 }
  0xa9   : > { %6089 = vst [vmem:[#allocation43_spill] sm:$0xff] %v4980_v56  ;;  %1060 = vmatpush.msrb.mxu3 %v4980_v56  ;;  %v5023_v56 = vsub.f32 %v954_v24, %v5006_v0  ;;  %v5032_v62 = vand.u32 4294901760, %v5018_v8  ;;  %v5039_v24 = vand.u32 4294901760, %v1082_v27  ;;  %v1094_v14 = vsub.f32 %v4993_v19, %v5015_v20  ;;  %997 = vmatpush.msrb.mxu2 %v4955_v34 }
  0xaa   : > { %6090 = vst [vmem:[#allocation44_spill] sm:$0xff] %v4985_v31  ;;  %473 = vmatmul.f32.gmra.mxu0 %v472_v21  ;;  %602 = vmatmul.f32.gmra.mxu1 %v4773_v28  ;;  %v6102_v21 = vand.u32 4294901760, %v4876_v6  ;;  %v480_v28 = vand.u32 4294901760, %v479_v43 }
  0xab   : > { %6091 = vst [vmem:[#allocation45_spill] sm:$0xff] %v4990_v51  ;;  %1066 = vmatpush.msrb.mxu3 %v4997_v39  ;;  %1218 = vmatpush.msra.mxu0 %v4822_v59  ;;  %v5057_v43 = vand.u32 4294901760, %v1094_v14 }
  0xac   : > { %6092 = vst [vmem:[#allocation46_spill] sm:$0xff] %v4993_v19  ;;  %774 = vmatmul.f32.gmra.mxu3 %v6102_v21  ;;  %1281 = vmatpush.msra.mxu1 %v4784_v49  ;;  %v5049_v21 = vand.u32 4294901760, %v1088_v16 }
  0xad   : > { %6093 = vst [vmem:[#allocation47_spill] sm:$0xff] %v4997_v39  ;;  %694 = vmatmul.f32.gmra.mxu2 %v4876_v6  ;;  %1072 = vmatpush.msrb.mxu3 %v5010_v12  ;;  %v5044_v39 = vand.u32 4294901760, %v5023_v56  ;;  %v1100_v6 = vsub.f32 %v5018_v8, %v5032_v62 }
  0xae   : > { %6094 = vst [vmem:[#allocation48_spill] sm:$0xff] %v5002_v1  ;;  %1222 = vmatpush.msra.mxu0 %v4828_v10  ;;  %999 = vmatpush.msrb.mxu2 %v4973_v40 }
  0xaf   : > { %6095 = vst [vmem:[#allocation49_spill] sm:$0xff] %v5006_v0  ;;  %1078 = vmatpush.msrb.mxu3 %v5027_v42  ;;  %1283 = vmatpush.msra.mxu1 %v4795_v57  ;;  %v1106_v27 = vsub.f32 %v5023_v56, %v5044_v39  ;;  %v5065_v16 = vand.u32 4294901760, %v1100_v6 }
  0xb0   : > { %6096 = vst [vmem:[#allocation50_spill] sm:$0xff] %v5010_v12  ;;  %1226 = vmatpush.msra.mxu0 %v4854_v54  ;;  %1001 = vmatpush.msrb.mxu2 %v4990_v51 }
  0xb1   : > { %6097 = vst [vmem:[#allocation51_spill] sm:$0xff] %v5015_v20  ;;  %1084 = vmatpush.msrb.mxu3 %v5039_v24  ;;  %1285 = vmatpush.msra.mxu1 %v4812_v52  ;;  %v5070_v14 = vand.u32 4294901760, %v1106_v27 }
  0xb2   : > { %6098 = vst [vmem:[#allocation52_spill] sm:$0xff] %v5018_v8  ;;  %481 = vmatmul.f32.gmra.mxu0 %v480_v28  ;;  %606 = vmatmul.f32.gmra.mxu1 %v4840_v41  ;;  %v970_v28 = vld [vmem:[#allocation2] sm:$0xff] }
  0xb3   : > { %6099 = vst [vmem:[#allocation53_spill] sm:$0xff] %v5023_v56  ;;  %1090 = vmatpush.msrb.mxu3 %v5049_v21  ;;  %1003 = vmatpush.msrb.mxu2 %v5006_v0 }
  0xb4   : > { %6100 = vst [vmem:[#allocation54_spill] sm:$0xff] %v5027_v42  ;;  %780 = vmatmul.f32.gmra.mxu3 %v478_v38  ;;  %1230 = vmatpush.msra.mxu0 %v4869_v15 }
  0xb5   : > { %6101 = vst [vmem:[#allocation55_spill] sm:$0xff] %v5032_v62  ;;  %699 = vmatmul.f32.gmra.mxu2 %v4953_v46  ;;  %1096 = vmatpush.msrb.mxu3 %v5057_v43  ;;  %v5090_v46 = vand.u32 4294901760, %v970_v28 }
  0xb6   : > { %6103 = vst [vmem:[#allocation56_spill] sm:$0xff] %v5039_v24  ;;  %1116 = vmatpush.msra.mxu2 %v4767_v11  ;;  %1287 = vmatpush.msra.mxu1 %v4830_v32 }
  0xb7   : > { %6104 = vst [vmem:[#allocation57_spill] sm:$0xff] %v5044_v39  ;;  %1102 = vmatpush.msrb.mxu3 %v5065_v16  ;;  %1234 = vmatpush.msra.mxu0 %v4892_v13  ;;  %v1005_v38 = vsub.f32 %v970_v28, %v5090_v46 }
  0xb8   : > { %6105 = vst [vmem:[#allocation58_spill] sm:$0xff] %v5049_v21  ;;  %1119 = vmatpush.msra.mxu2 %v4782_v36  ;;  %1289 = vmatpush.msra.mxu1 %v4845_v17 }
  0xb9   : > { %6106 = vst [vmem:[#allocation59_spill] sm:$0xff] %v5057_v43  ;;  %1108 = vmatpush.msrb.mxu3 %v5070_v14  ;;  %1238 = vmatpush.msra.mxu0 %v4909_v23  ;;  %v1006_v6 = vand.u32 4294901760, %v1005_v38 }
  0xba   : > { %6107 = vst [vmem:[#allocation60_spill] sm:$0xff] %v5065_v16  ;;  %610 = vmatmul.f32.gmra.mxu1 %v4912_v29  ;;  %849 = vmatmul.f32.vlgmr.msrb.gmra.mxu0 %v4640_v4 }
  0xbb   : > { %6108 = vst [vmem:[#allocation61_spill] sm:$0xff] %v5070_v14  ;;  %1169 = vmatpush.msra.mxu3 %v4760_v26  ;;  %1122 = vmatpush.msra.mxu2 %v4805_v37  ;;  %v1007_v27 = vsub.f32 %v1005_v38, %v1006_v6 }
  0xbc   : > { %1291 = vmatpush.msra.mxu1 %v4860_v25  ;;  %1242 = vmatpush.msra.mxu0 %v4929_v2 }
  0xbd   : > { %1171 = vmatpush.msra.mxu3 %v4769_v22  ;;  %1125 = vmatpush.msra.mxu2 %v4815_v55  ;;  %v1008_v28 = vand.u32 4294901760, %v1007_v27  ;;  %v6115_v27 = vld [vmem:[#allocation33_spill] sm:$0xff] }
  0xbe   : > { %1293 = vmatpush.msra.mxu1 %v4880_v7  ;;  %1246 = vmatpush.msra.mxu0 %v4943_v35 }
  0xbf   : > { %1173 = vmatpush.msra.mxu3 %v4784_v49  ;;  %1128 = vmatpush.msra.mxu2 %v4833_v44 }
  0xc0   : > { %1295 = vmatpush.msra.mxu1 %v4899_v50  ;;  %1250 = vmatpush.msra.mxu0 %v4968_v63 }
  0xc1   : > { %1175 = vmatpush.msra.mxu3 %v4795_v57  ;;  %1131 = vmatpush.msra.mxu2 %v4848_v9 }
  0xc2   : > { %853 = vmatmul.f32.gmra.mxu0 %v4673_v45  ;;  %914 = vmatmul.f32.vlgmr.msrb.gmra.mxu1 %v4640_v4  ;;  %v6109_v4 = vld [vmem:[#allocation21_spill] sm:$0xff] }
  0xc3   : > { %1177 = vmatpush.msra.mxu3 %v4812_v52  ;;  %1134 = vmatpush.msra.mxu2 %v4872_v48 }
  0xc4   : > { %1110 = vmatmul.f32.vlgmr.msrb.gmra.mxu3 %v5090_v46  ;;  %1297 = vmatpush.msra.mxu1 %v4917_v5 }
  0xc5   : > { %1179 = vmatpush.msra.mxu3 %v4830_v32  ;;  %1137 = vmatpush.msra.mxu2 %v4883_v3 }
  0xc6   : > { %1009 = vmatmul.f32.vlgmr.msrb.gmra.mxu2 %v1008_v28  ;;  %1254 = vmatpush.msra.mxu0 %v4985_v31  ;;  %v6116_v28 = vld [vmem:[#allocation34_spill] sm:$0xff] }
  0xc7   : > { %1181 = vmatpush.msra.mxu3 %v4845_v17  ;;  %1140 = vmatpush.msra.mxu2 %v4902_v53 }
  0xc8   : > { %1299 = vmatpush.msra.mxu1 %v4934_v18  ;;  %1258 = vmatpush.msra.mxu0 %v5002_v1 }
  0xc9   : > { %1183 = vmatpush.msra.mxu3 %v4860_v25  ;;  %1143 = vmatpush.msra.mxu2 %v4920_v60 }
  0xca   : > { %857 = vmatmul.f32.gmra.mxu0 %v4712_v47  ;;  %918 = vmatmul.f32.gmra.mxu1 %v4673_v45  ;;  %v6110_v45 = vld [vmem:[#allocation25_spill] sm:$0xff] }
  0xcb   : > { %1185 = vmatpush.msra.mxu3 %v4880_v7  ;;  %1146 = vmatpush.msra.mxu2 %v4946_v30 }
  0xcc   : > { %1301 = vmatpush.msra.mxu1 %v4955_v34  ;;  %1262 = vmatpush.msra.mxu0 %v5015_v20 }
  0xcd   : > { %1187 = vmatpush.msra.mxu3 %v4899_v50  ;;  %1149 = vmatpush.msra.mxu2 %v4958_v61 }
  0xce   : > { %1303 = vmatpush.msra.mxu1 %v4973_v40  ;;  %1266 = vmatpush.msra.mxu0 %v5032_v62 }
  0xcf   : > { %1189 = vmatpush.msra.mxu3 %v4917_v5  ;;  %1152 = vmatpush.msra.mxu2 %v4976_v58 }
  0xd0   : > { %1270 = vmatpush.msra.mxu0 %v5044_v39  ;;  %1305 = vmatpush.msra.mxu1 %v4990_v51 }
  0xd1   : > { %1191 = vmatpush.msra.mxu3 %v4934_v18  ;;  %1155 = vmatpush.msra.mxu2 %v4993_v19 }
  0xd2   : > { %861 = vmatmul.f32.gmra.mxu0 %v4732_v33  ;;  %922 = vmatmul.f32.gmra.mxu1 %v4712_v47  ;;  %v6111_v47 = vld [vmem:[#allocation26_spill] sm:$0xff] }
  0xd3   : > { %1193 = vmatpush.msra.mxu3 %v4955_v34  ;;  %1158 = vmatpush.msra.mxu2 %v5018_v8 }
  0xd4   : > { %1307 = vmatpush.msra.mxu1 %v5006_v0  ;;  %1464 = vmatpush.msrb.mxu0 %v4767_v11 }
  0xd5   : > { %1195 = vmatpush.msra.mxu3 %v4973_v40  ;;  %1161 = vmatpush.msra.mxu2 %v5023_v56 }
  0xd6   : > { %1164 = vmatmul.f32.vlgmr.msra.gmra.mxu2 %v1005_v38  ;;  %1517 = vmatpush.msrb.mxu1 %v4760_v26  ;;  %v6113_v38 = vld [vmem:[#allocation22_spill] sm:$0xff] }
  0xd7   : > { %1197 = vmatpush.msra.mxu3 %v4990_v51  ;;  %1321 = vmatpush.msrb.mxu2 %v4760_v26 }
  0xd8   : > { %1467 = vmatpush.msrb.mxu0 %v4782_v36  ;;  %1519 = vmatpush.msrb.mxu1 %v4769_v22 }
  0xd9   : > { %1199 = vmatpush.msra.mxu3 %v5006_v0  ;;  %1323 = vmatpush.msrb.mxu2 %v4769_v22 }
  0xda   : > { %865 = vmatmul.f32.gmra.mxu0 %v6109_v4  ;;  %926 = vmatmul.f32.gmra.mxu1 %v4732_v33  ;;  %v6112_v33 = vld [vmem:[#allocation29_spill] sm:$0xff] }
  0xdb   : > { %1203 = vmatmul.f32.vlgmr.msra.gmra.mxu3 %v1006_v6  ;;  %1325 = vmatpush.msrb.mxu2 %v4784_v49  ;;  %v6114_v6 = vld [vmem:[#allocation30_spill] sm:$0xff] }
  0xdc   : > { %1366 = vmatpush.msrb.mxu3 %v6110_v45  ;;  %1470 = vmatpush.msrb.mxu0 %v4805_v37 }
  0xdd   : > { %1327 = vmatpush.msrb.mxu2 %v4795_v57  ;;  %1521 = vmatpush.msrb.mxu1 %v4784_v49 }
  0xde   : > { %1372 = vmatpush.msrb.mxu3 %v6111_v47  ;;  %1473 = vmatpush.msrb.mxu0 %v4815_v55 }
  0xdf   : > { %1329 = vmatpush.msrb.mxu2 %v4812_v52  ;;  %1523 = vmatpush.msrb.mxu1 %v4795_v57 }
  0xe0   : > { %1378 = vmatpush.msrb.mxu3 %v6112_v33  ;;  %1476 = vmatpush.msrb.mxu0 %v4833_v44  ;;  %v6118_v44 = vld [vmem:[#allocation43_spill] sm:$0xff] }
  0xe1   : > { %1331 = vmatpush.msrb.mxu2 %v4830_v32  ;;  %1525 = vmatpush.msrb.mxu1 %v4812_v52 }
  0xe2   : > { %869 = vmatmul.f32.gmra.mxu0 %v6113_v38  ;;  %930 = vmatmul.f32.gmra.mxu1 %v6109_v4  ;;  %v6117_v4 = vld [vmem:[#allocation39_spill] sm:$0xff] }
  0xe3   : > { %1384 = vmatpush.msrb.mxu3 %v6114_v6  ;;  %1333 = vmatpush.msrb.mxu2 %v4845_v17 }
  0xe4   : > { %1479 = vmatpush.msrb.mxu0 %v4848_v9  ;;  %1527 = vmatpush.msrb.mxu1 %v4830_v32  ;;  %v6119_v9 = vld [vmem:[#allocation47_spill] sm:$0xff] }
  0xe5   : > { %1390 = vmatpush.msrb.mxu3 %v6115_v27  ;;  %1335 = vmatpush.msrb.mxu2 %v4860_v25 }
  0xe6   : > { %1482 = vmatpush.msrb.mxu0 %v4872_v48  ;;  %1529 = vmatpush.msrb.mxu1 %v4845_v17 }
  0xe7   : > { %1396 = vmatpush.msrb.mxu3 %v6116_v28  ;;  %1337 = vmatpush.msrb.mxu2 %v4880_v7 }
  0xe8   : > { %1485 = vmatpush.msrb.mxu0 %v4883_v3  ;;  %1531 = vmatpush.msrb.mxu1 %v4860_v25 }
  0xe9   : > { %1402 = vmatpush.msrb.mxu3 %v6117_v4  ;;  %1339 = vmatpush.msrb.mxu2 %v4899_v50 }
  0xea   : > { %873 = vmatmul.f32.gmra.mxu0 %v4840_v41  ;;  %934 = vmatmul.f32.gmra.mxu1 %v6113_v38  ;;  %v6120_v38 = vld [vmem:[#allocation23_spill] sm:$0xff] }
  0xeb   : > { %1408 = vmatpush.msrb.mxu3 %v6118_v44  ;;  %1341 = vmatpush.msrb.mxu2 %v4917_v5 }
  0xec   : > { %1488 = vmatpush.msrb.mxu0 %v4902_v53  ;;  %1533 = vmatpush.msrb.mxu1 %v4880_v7 }
  0xed   : > { %1414 = vmatpush.msrb.mxu3 %v6119_v9  ;;  %1343 = vmatpush.msrb.mxu2 %v4934_v18 }
  0xee   : > { %1491 = vmatpush.msrb.mxu0 %v4920_v60  ;;  %1535 = vmatpush.msrb.mxu1 %v4899_v50 }
  0xef   : > { %1420 = vmatpush.msrb.mxu3 %v5010_v12  ;;  %1345 = vmatpush.msrb.mxu2 %v4955_v34 }
  0xf0   : > { %1494 = vmatpush.msrb.mxu0 %v4946_v30  ;;  %1537 = vmatpush.msrb.mxu1 %v4917_v5 }
  0xf1   : > { %1426 = vmatpush.msrb.mxu3 %v5027_v42  ;;  %1347 = vmatpush.msrb.mxu2 %v4973_v40 }
  0xf2   : > { %877 = vmatmul.f32.gmra.mxu0 %v4912_v29  ;;  %938 = vmatmul.f32.gmra.mxu1 %v4840_v41  ;;  %v6121_v41 = vld [vmem:[#allocation24_spill] sm:$0xff] }
  0xf3   : > { %1432 = vmatpush.msrb.mxu3 %v5039_v24  ;;  %1349 = vmatpush.msrb.mxu2 %v4990_v51 }
  0xf4   : > { %1497 = vmatpush.msrb.mxu0 %v4958_v61  ;;  %1539 = vmatpush.msrb.mxu1 %v4934_v18 }
  0xf5   : > { %1438 = vmatpush.msrb.mxu3 %v5049_v21  ;;  %1351 = vmatpush.msrb.mxu2 %v5006_v0 }
  0xf6   : > { %1500 = vmatpush.msrb.mxu0 %v4976_v58  ;;  %1541 = vmatpush.msrb.mxu1 %v4955_v34 }
  0xf7   : > { %1558 = vmatpush.msra.mxu2 %v6120_v38  ;;  %v5202_v60 = vpop.f32.mrf.mxu0  ;;  %1444 = vmatpush.msrb.mxu3 %v5057_v43 }
  0xf8   : > { %1503 = vmatpush.msrb.mxu0 %v4993_v19  ;;  %1543 = vmatpush.msrb.mxu1 %v4973_v40 }
  0xf9   : > { %1562 = vmatpush.msra.mxu2 %v6121_v41  ;;  %1450 = vmatpush.msrb.mxu3 %v5065_v16 }
  0xfa   : > { %942 = vmatmul.f32.gmra.mxu1 %v4912_v29  ;;  %1272 = vmatmul.f32.vlgmr.msra.gmra.mxu0 %v5090_v46 }
  0xfb   : > { %1456 = vmatpush.msrb.mxu3 %v5070_v14  ;;  %1566 = vmatpush.msra.mxu2 %v4822_v59 }
  0xfc   : > { %1506 = vmatpush.msrb.mxu0 %v5018_v8  ;;  %1545 = vmatpush.msrb.mxu1 %v4990_v51 }
  0xfd   : > { %1625 = vmatpush.msra.mxu3 %v4760_v26  ;;  %1570 = vmatpush.msra.mxu2 %v4828_v10 }
  0xfe   : > { %1509 = vmatpush.msrb.mxu0 %v5023_v56  ;;  %1547 = vmatpush.msrb.mxu1 %v5006_v0 }
  0xff   : > { %1627 = vmatpush.msra.mxu3 %v4769_v22  ;;  %v5220_v58 = vpop.f32.mrf.mxu0  ;;  %v5222_v29 = vpop.f32.mrf.mxu1  ;;  %1574 = vmatpush.msra.mxu2 %v4854_v54 }
 0x100   : > { %1669 = vmatpush.msra.mxu0 %v4760_v26 }
 0x101   : > { %1629 = vmatpush.msra.mxu3 %v4784_v49  ;;  %1578 = vmatpush.msra.mxu2 %v4869_v15 }
 0x102   : > { %1309 = vmatmul.f32.vlgmr.msra.gmra.mxu1 %v5090_v46  ;;  %1671 = vmatpush.msra.mxu0 %v4769_v22 }
 0x103   : > { %1631 = vmatpush.msra.mxu3 %v4795_v57  ;;  %1582 = vmatpush.msra.mxu2 %v4892_v13 }
 0x104   : > { %1714 = vmatpush.msra.mxu1 %v6110_v45  ;;  %1673 = vmatpush.msra.mxu0 %v4784_v49 }
 0x105   : > { %1633 = vmatpush.msra.mxu3 %v4812_v52  ;;  %1586 = vmatpush.msra.mxu2 %v4909_v23 }
 0x106   : > { %1720 = vmatpush.msra.mxu1 %v6111_v47  ;;  %1675 = vmatpush.msra.mxu0 %v4795_v57 }
 0x107   : > { %1635 = vmatpush.msra.mxu3 %v4830_v32  ;;  %v5240_v56 = vpop.f32.mrf.mxu0  ;;  %v5242_v46 = vpop.f32.mrf.mxu1  ;;  %1590 = vmatpush.msra.mxu2 %v4929_v2 }
 0x108   : > { %1726 = vmatpush.msra.mxu1 %v6112_v33  ;;  %1677 = vmatpush.msra.mxu0 %v4812_v52 }
 0x109   : > { %1637 = vmatpush.msra.mxu3 %v4845_v17  ;;  %1594 = vmatpush.msra.mxu2 %v4943_v35 }
 0x10a   : > { %1732 = vmatpush.msra.mxu1 %v6114_v6  ;;  %1679 = vmatpush.msra.mxu0 %v4830_v32 }
 0x10b   : > { %1639 = vmatpush.msra.mxu3 %v4860_v25  ;;  %1598 = vmatpush.msra.mxu2 %v4968_v63 }
 0x10c   : > { %1738 = vmatpush.msra.mxu1 %v6115_v27  ;;  %1681 = vmatpush.msra.mxu0 %v4845_v17 }
 0x10d   : > { %1641 = vmatpush.msra.mxu3 %v4880_v7  ;;  %1602 = vmatpush.msra.mxu2 %v4985_v31 }
 0x10e   : > { %1744 = vmatpush.msra.mxu1 %v6116_v28  ;;  %1683 = vmatpush.msra.mxu0 %v4860_v25 }
 0x10f   : > { %1643 = vmatpush.msra.mxu3 %v4899_v50  ;;  %v5260_v6 = vpop.f32.mrf.mxu0  ;;  %v5262_v33 = vpop.f32.mrf.mxu1  ;;  %1606 = vmatpush.msra.mxu2 %v5002_v1 }
 0x110   : > { %1750 = vmatpush.msra.mxu1 %v6117_v4  ;;  %1685 = vmatpush.msra.mxu0 %v4880_v7 }
 0x111   : > { %1645 = vmatpush.msra.mxu3 %v4917_v5  ;;  %1610 = vmatpush.msra.mxu2 %v5015_v20 }
 0x112   : > { %1756 = vmatpush.msra.mxu1 %v6118_v44  ;;  %1687 = vmatpush.msra.mxu0 %v4899_v50 }
 0x113   : > { %1647 = vmatpush.msra.mxu3 %v4934_v18  ;;  %1614 = vmatpush.msra.mxu2 %v5032_v62 }
 0x114   : > { %1762 = vmatpush.msra.mxu1 %v6119_v9  ;;  %1689 = vmatpush.msra.mxu0 %v4917_v5  ;;  %v665_v9 = vpop.f32.mrf.mxu2 }
 0x115   : > { %1649 = vmatpush.msra.mxu3 %v4955_v34  ;;  %1618 = vmatpush.msra.mxu2 %v5044_v39 }
 0x116   : > { %1768 = vmatpush.msra.mxu1 %v5010_v12  ;;  %1691 = vmatpush.msra.mxu0 %v4934_v18  ;;  %v739_v12 = vpop.f32.mrf.mxu3 }
 0x117   : > { %1651 = vmatpush.msra.mxu3 %v4973_v40  ;;  %v5280_v44 = vpop.f32.mrf.mxu0  ;;  %v595_v4 = vpop.f32.mrf.mxu1 }
 0x118   : > { %1774 = vmatpush.msra.mxu1 %v5027_v42  ;;  %1693 = vmatpush.msra.mxu0 %v4955_v34 }
 0x119   : > { %1653 = vmatpush.msra.mxu3 %v4990_v51 }
 0x11a   : > { %1780 = vmatpush.msra.mxu1 %v5039_v24  ;;  %1695 = vmatpush.msra.mxu0 %v4973_v40 }
 0x11b   : > { %1655 = vmatpush.msra.mxu3 %v5006_v0 }
 0x11c   : > { %1786 = vmatpush.msra.mxu1 %v5049_v21  ;;  %1697 = vmatpush.msra.mxu0 %v4990_v51  ;;  %v670_v24 = vpop.f32.mrf.mxu2 }
 0x11e   : > { %1792 = vmatpush.msra.mxu1 %v5057_v43  ;;  %1699 = vmatpush.msra.mxu0 %v5006_v0  ;;  %v745_v39 = vpop.f32.mrf.mxu3  ;;  %v5301_v43 = vld [vmem:[%s5950_s4] ss:$0 sm:$0xff] }
 0x11f   : > { %v466_v42 = vpop.f32.mrf.mxu0  ;;  %v599_v28 = vpop.f32.mrf.mxu1  ;;  %v435_v1 = vadd.f32 %v5301_v43, %v5220_v58 }
 0x120   : > { %1798 = vmatpush.msra.mxu1 %v5065_v16 }
 0x121   : > { %v588_v51 = vadd.f32 %v5242_v46, %v435_v1 }
 0x122   : > { %1804 = vmatpush.msra.mxu1 %v5070_v14  ;;  %v427_v14 = vadd.f32 %v5301_v43, %v5202_v60 }
 0x124   : > { %v675_v8 = vpop.f32.mrf.mxu2  ;;  %v584_v19 = vadd.f32 %v5222_v29, %v427_v14  ;;  %v443_v14 = vadd.f32 %v5301_v43, %v5240_v56  ;;  %v671_v29 = vadd.f32 %v670_v24, %v588_v51 }
 0x126   : > { %v751_v47 = vpop.f32.mrf.mxu3  ;;  %v666_v0 = vadd.f32 %v665_v9, %v584_v19  ;;  %v746_v53 = vadd.f32 %v745_v39, %v671_v29  ;;  %v592_v58 = vadd.f32 %v5262_v33, %v443_v14  ;;  %v459_v39 = vadd.f32 %v5301_v43, %v5280_v44 }
 0x127   : > { %v5296_v27 = vpop.f32.mrf.mxu0  ;;  %v603_v21 = vpop.f32.mrf.mxu1 }
 0x128   : > { %v740_v31 = vadd.f32 %v739_v12, %v666_v0  ;;  %v676_v12 = vadd.f32 %v675_v8, %v592_v58  ;;  %v600_v14 = vadd.f32 %v599_v28, %v459_v39 }
 0x12a   : > { %v752_v46 = vadd.f32 %v751_v47, %v676_v12 }
 0x12c   : > { %v680_v61 = vpop.f32.mrf.mxu2 }
 0x12e   : > { %v757_v30 = vpop.f32.mrf.mxu3 }
 0x12f   : > { %v5303_v62 = vpop.f32.mrf.mxu0  ;;  %v5305_v16 = vpop.f32.mrf.mxu1 }
 0x134   : > { %v685_v34 = vpop.f32.mrf.mxu2 }
 0x135   : > { %v686_v58 = vadd.f32 %v685_v34, %v600_v14 }
 0x136   : > { %v763_v9 = vpop.f32.mrf.mxu3 }
 0x137   : > { %v5310_v20 = vpop.f32.mrf.mxu1  ;;  %v850_v45 = vpop.f32.mrf.mxu0 }
 0x138   : > { %v851_v63 = vadd.f32 %v850_v45, %v740_v31  ;;  %v451_v31 = vadd.f32 %v5301_v43, %v5260_v6 }
 0x13a   : > { %v596_v56 = vadd.f32 %v595_v4, %v451_v31  ;;  %v467_v4 = vadd.f32 %v5301_v43, %v466_v42 }
 0x13c   : > { %v690_v51 = vpop.f32.mrf.mxu2  ;;  %v604_v31 = vadd.f32 %v603_v21, %v467_v4  ;;  %v483_v21 = vadd.f32 %v5301_v43, %v5303_v62 }
 0x13e   : > { %v769_v33 = vpop.f32.mrf.mxu3  ;;  %v691_v28 = vadd.f32 %v690_v51, %v604_v31  ;;  %v612_v51 = vadd.f32 %v5310_v20, %v483_v21  ;;  %v971_v31 = vld [vmem:[%s4491_s18] sm:$0xff]  ;;  %v6126_v21 = vld [vmem:[#allocation35_spill] sm:$0xff] }
 0x13f   : > { %v854_v40 = vpop.f32.mrf.mxu0  ;;  %v915_v60 = vpop.f32.mrf.mxu1 }
 0x140   : > { %v916_v35 = vadd.f32 %v915_v60, %v851_v63  ;;  %v855_v19 = vadd.f32 %v854_v40, %v746_v53  ;;  %v681_v53 = vadd.f32 %v680_v61, %v596_v56  ;;  %v770_v56 = vadd.f32 %v769_v33, %v691_v28 }
 0x142   : > { %946 = vst [vmem:[%s4510_s19] sm:$0xff] %v916_v35  ;;  %v758_v60 = vadd.f32 %v757_v30, %v681_v53  ;;  %v475_v30 = vadd.f32 %v5301_v43, %v5296_v27 }
 0x144   : > { %v695_v6 = vpop.f32.mrf.mxu2  ;;  %v608_v42 = vadd.f32 %v5305_v16, %v475_v30 }
 0x147   : > { %v858_v0 = vpop.f32.mrf.mxu0  ;;  %v919_v1 = vpop.f32.mrf.mxu1 }
 0x148   : > { %v920_v45 = vadd.f32 %v919_v1, %v855_v19  ;;  %v859_v63 = vadd.f32 %v858_v0, %v752_v46  ;;  %v775_v0 = vpop.f32.mrf.mxu3  ;;  %v764_v1 = vadd.f32 %v763_v9, %v686_v58 }
 0x14a   : > { %947 = vst [vmem:[%s4510_s19 + $0x8] sm:$0xff] %v920_v45 }
 0x14c   : > { %v700_v46 = vpop.f32.mrf.mxu2 }
 0x14d   : > { %v701_v16 = vadd.f32 %v700_v46, %v612_v51  ;;  %v6131_v51 = vld [vmem:[#allocation45_spill] sm:$0xff] }
 0x14f   : > { %v862_v24 = vpop.f32.mrf.mxu0  ;;  %v923_v35 = vpop.f32.mrf.mxu1 }
 0x150   : > { %v924_v40 = vadd.f32 %v923_v35, %v859_v63  ;;  %v863_v8 = vadd.f32 %v862_v24, %v758_v60  ;;  %v781_v34 = vpop.f32.mrf.mxu3  ;;  %v696_v35 = vadd.f32 %v695_v6, %v608_v42 }
 0x151   : > { %v782_v62 = vadd.f32 %v781_v34, %v701_v16  ;;  %v6122_v34 = vld [vmem:[#allocation27_spill] sm:$0xff]  ;;  %v6135_v16 = vld [vmem:[#allocation48_spill] sm:$0xff] }
 0x152   : > { %948 = vst [vmem:[%s4510_s19 + $0x10] sm:$0xff] %v924_v40  ;;  %v776_v27 = vadd.f32 %v775_v0, %v696_v35  ;;  %v6127_v35 = vld [vmem:[#allocation32_spill] sm:$0xff] }
 0x154   : > { %v1010_v53 = vpop.f32.mrf.mxu2 }
 0x157   : > { %v866_v29 = vpop.f32.mrf.mxu0  ;;  %v927_v47 = vpop.f32.mrf.mxu1 }
 0x158   : > { %v928_v19 = vadd.f32 %v927_v47, %v863_v8  ;;  %v867_v44 = vadd.f32 %v866_v29, %v764_v1  ;;  %v1111_v40 = vpop.f32.mrf.mxu3 }
 0x159   : > { %v1112_v29 = vadd.f32 %v1111_v40, %v1010_v53  ;;  %v6129_v53 = vld [vmem:[#allocation40_spill] sm:$0xff] }
 0x15a   : > { %949 = vst [vmem:[%s4510_s19 + $0x18] sm:$0xff] %v928_v19  ;;  %v6132_v40 = vld [vmem:[#allocation44_spill] sm:$0xff] }
 0x15c   : > { %v1165_v47 = vpop.f32.mrf.mxu2 }
 0x15d   : > { %v1166_v6 = vadd.f32 %v1165_v47, %v1112_v29  ;;  %v6138_v29 = vld [vmem:[#allocation51_spill] sm:$0xff]  ;;  %v6139_v47 = vld [vmem:[#allocation46_spill] sm:$0xff] }
 0x15f   : > { %v870_v61 = vpop.f32.mrf.mxu0  ;;  %v931_v12 = vpop.f32.mrf.mxu1 }
 0x160   : > { %v932_v45 = vadd.f32 %v931_v12, %v867_v44  ;;  %v871_v63 = vadd.f32 %v870_v61, %v770_v56  ;;  %v1204_v4 = vpop.f32.mrf.mxu3 }
 0x161   : > { %v1205_v0 = vadd.f32 %v1204_v4, %v1166_v6  ;;  %v6142_v6 = vld [vmem:[#allocation52_spill] sm:$0xff]  ;;  %v6143_v4 = vld [vmem:[#allocation29_spill] sm:$0xff] }
 0x162   : > { %950 = vst [vmem:[%s4510_s19 + $0x20] sm:$0xff] %v932_v45 }
 0x167   : > { %v874_v24 = vpop.f32.mrf.mxu0  ;;  %v935_v9 = vpop.f32.mrf.mxu1 }
 0x168   : > { %v936_v39 = vadd.f32 %v935_v9, %v871_v63  ;;  %v875_v33 = vadd.f32 %v874_v24, %v776_v27  ;;  %v6123_v63 = vld [vmem:[#allocation28_spill] sm:$0xff]  ;;  %v6124_v24 = vld [vmem:[#allocation31_spill] sm:$0xff]  ;;  %v6125_v9 = vld [vmem:[#allocation37_spill] sm:$0xff] }
 0x169   : > { %v6130_v27 = vld [vmem:[#allocation36_spill] sm:$0xff] }
 0x16a   : > { %951 = vst [vmem:[%s4510_s19 + $0x28] sm:$0xff] %v936_v39  ;;  %v6128_v39 = vld [vmem:[#allocation41_spill] sm:$0xff] }
 0x16f   : > { %v939_v60 = vpop.f32.mrf.mxu1  ;;  %v878_v8 = vpop.f32.mrf.mxu0 }
 0x170   : > { %v940_v14 = vadd.f32 %v939_v60, %v875_v33  ;;  %v879_v43 = vadd.f32 %v878_v8, %v782_v62  ;;  %v6133_v33 = vld [vmem:[#allocation38_spill] sm:$0xff]  ;;  %v6134_v60 = vld [vmem:[#allocation49_spill] sm:$0xff] }
 0x171   : > { %v6137_v8 = vld [vmem:[#allocation25_spill] sm:$0xff]  ;;  %v6140_v62 = vld [vmem:[#allocation26_spill] sm:$0xff] }
 0x172   : > { %952 = vst [vmem:[%s4510_s19 + $0x30] sm:$0xff] %v940_v14  ;;  %v6136_v14 = vld [vmem:[#allocation42_spill] sm:$0xff] }
 0x177   : > { %v943_v58 = vpop.f32.mrf.mxu1  ;;  %v1273_v20 = vpop.f32.mrf.mxu0 }
 0x178   : > { %v944_v19 = vadd.f32 %v943_v58, %v879_v43  ;;  %v1274_v1 = vadd.f32 %v1273_v20, %v1205_v0  ;;  %v6141_v43 = vld [vmem:[#allocation55_spill] sm:$0xff]  ;;  %v6144_v58 = vld [vmem:[#allocation57_spill] sm:$0xff]  ;;  %v6146_v0 = vld [vmem:[#allocation30_spill] sm:$0xff] }
 0x179   : > { %v6147_v20 = vld [vmem:[#allocation33_spill] sm:$0xff] }
 0x17a   : > { %953 = vst [vmem:[%s4510_s19 + $0x38] sm:$0xff] %v944_v19  ;;  %v6145_v19 = vld [vmem:[#allocation53_spill] sm:$0xff] }
 0x17f   : > { %v1310_v44 = vpop.f32.mrf.mxu1 }
 0x180   : > { %v1311_v61 = vadd.f32 %v1310_v44, %v1274_v1  ;;  %v6148_v1 = vld [vmem:[#allocation34_spill] sm:$0xff]  ;;  %v6150_v44 = vld [vmem:[#allocation43_spill] sm:$0xff] }
 0x182   : > { %v1313_v12 = vadd.f32 %v1311_v61, %v971_v31  ;;  %v6149_v31 = vld [vmem:[#allocation39_spill] sm:$0xff] }
 0x183   : > { %v6151_v61 = vld [vmem:[#allocation47_spill] sm:$0xff] }
 0x184   : > { %4070 = vtanh.f32 %v1313_v12  ;;  %v6152_v12 = vld [vmem:[#allocation50_spill] sm:$0xff] }
 0x18a   : > { %v4071_v30 = vpop.eup %4070 }
 0x18b   : > { %1317 = vst [vmem:[%s5339_s17] sm:$0xff] %v4071_v30  ;;  %v1352_v28 = vand.u32 4294901760, %v4071_v30 }
 0x18d   : > { %1458 = vmatmul.f32.vlgmr.msrb.gmra.mxu3 %v1352_v28  ;;  %v1353_v45 = vsub.f32 %v4071_v30, %v1352_v28  ;;  %v6153_v30 = vld [vmem:[#allocation54_spill] sm:$0xff] }
 0x18e   : > { %1865 = vmatpush.msrb.mxu3 %v4760_v26 }
 0x18f   : > { %1512 = vmatmul.f32.vlgmr.msrb.gmra.mxu0 %v1353_v45  ;;  %v1354_v46 = vand.u32 4294901760, %v1353_v45 }
 0x190   : > { %1867 = vmatpush.msrb.mxu3 %v4769_v22  ;;  %1906 = vmatpush.msrb.mxu0 %v6120_v38 }
 0x191   : > { %1551 = vmatmul.f32.vlgmr.msrb.gmra.mxu1 %v1354_v46  ;;  %v1355_v56 = vsub.f32 %v1353_v45, %v1354_v46  ;;  %v6155_v45 = vld [vmem:[#allocation58_spill] sm:$0xff]  ;;  %v6156_v46 = vld [vmem:[#allocation59_spill] sm:$0xff] }
 0x192   : > { %1869 = vmatpush.msrb.mxu3 %v4784_v49  ;;  %1973 = vmatpush.msrb.mxu1 %v4760_v26 }
 0x193   : > { %v1356_v42 = vand.u32 4294901760, %v1355_v56  ;;  %1910 = vmatpush.msrb.mxu0 %v6121_v41  ;;  %v6157_v56 = vld [vmem:[#allocation60_spill] sm:$0xff] }
 0x194   : > { %1871 = vmatpush.msrb.mxu3 %v4795_v57  ;;  %1975 = vmatpush.msrb.mxu1 %v4769_v22 }
 0x195   : > { %1357 = vmatmul.f32.vlgmr.msrb.gmra.mxu2 %v1356_v42  ;;  %1657 = vmatmul.f32.vlgmr.msra.gmra.mxu3 %v1352_v28  ;;  %v6158_v42 = vld [vmem:[#allocation61_spill] sm:$0xff] }
 0x196   : > { %1812 = vmatpush.msrb.mxu2 %v4767_v11  ;;  %1873 = vmatpush.msrb.mxu3 %v4812_v52 }
 0x197   : > { %1977 = vmatpush.msrb.mxu1 %v4784_v49  ;;  %1914 = vmatpush.msrb.mxu0 %v4822_v59 }
 0x198   : > { %1815 = vmatpush.msrb.mxu2 %v4782_v36  ;;  %1875 = vmatpush.msrb.mxu3 %v4830_v32 }
 0x199   : > { %1979 = vmatpush.msrb.mxu1 %v4795_v57  ;;  %1918 = vmatpush.msrb.mxu0 %v4828_v10 }
 0x19a   : > { %1818 = vmatpush.msrb.mxu2 %v4805_v37  ;;  %1877 = vmatpush.msrb.mxu3 %v4845_v17 }
 0x19b   : > { %1981 = vmatpush.msrb.mxu1 %v4812_v52  ;;  %1922 = vmatpush.msrb.mxu0 %v4854_v54 }
 0x19c   : > { %1821 = vmatpush.msrb.mxu2 %v4815_v55  ;;  %1879 = vmatpush.msrb.mxu3 %v4860_v25 }
 0x19d   : > { %1620 = vmatmul.f32.vlgmr.msra.gmra.mxu2 %v1352_v28  ;;  %1983 = vmatpush.msrb.mxu1 %v4830_v32  ;;  %v6154_v28 = vld [vmem:[#allocation56_spill] sm:$0xff] }
 0x19e   : > { %1824 = vmatpush.msrb.mxu2 %v6122_v34  ;;  %1881 = vmatpush.msrb.mxu3 %v4880_v7 }
 0x19f   : > { %1985 = vmatpush.msrb.mxu1 %v4845_v17  ;;  %1926 = vmatpush.msrb.mxu0 %v4869_v15 }
 0x1a0   : > { %1827 = vmatpush.msrb.mxu2 %v6123_v63  ;;  %1883 = vmatpush.msrb.mxu3 %v4899_v50 }
 0x1a1   : > { %1987 = vmatpush.msrb.mxu1 %v4860_v25  ;;  %1930 = vmatpush.msrb.mxu0 %v4892_v13 }
 0x1a2   : > { %1830 = vmatpush.msrb.mxu2 %v4872_v48  ;;  %1885 = vmatpush.msrb.mxu3 %v4917_v5 }
 0x1a3   : > { %1989 = vmatpush.msrb.mxu1 %v4880_v7  ;;  %1934 = vmatpush.msrb.mxu0 %v4909_v23 }
 0x1a4   : > { %1833 = vmatpush.msrb.mxu2 %v4883_v3  ;;  %1887 = vmatpush.msrb.mxu3 %v4934_v18 }
 0x1a5   : > { %1991 = vmatpush.msrb.mxu1 %v4899_v50  ;;  %1938 = vmatpush.msrb.mxu0 %v4929_v2 }
 0x1a6   : > { %1836 = vmatpush.msrb.mxu2 %v6124_v24  ;;  %1889 = vmatpush.msrb.mxu3 %v6125_v9 }
 0x1a7   : > { %1993 = vmatpush.msrb.mxu1 %v4917_v5  ;;  %1942 = vmatpush.msrb.mxu0 %v6126_v21 }
 0x1a8   : > { %1839 = vmatpush.msrb.mxu2 %v6127_v35  ;;  %1891 = vmatpush.msrb.mxu3 %v6128_v39 }
 0x1a9   : > { %1995 = vmatpush.msrb.mxu1 %v4934_v18  ;;  %1946 = vmatpush.msrb.mxu0 %v6129_v53 }
 0x1aa   : > { %1842 = vmatpush.msrb.mxu2 %v6130_v27  ;;  %1893 = vmatpush.msrb.mxu3 %v6131_v51 }
 0x1ab   : > { %1997 = vmatpush.msrb.mxu1 %v6125_v9  ;;  %1950 = vmatpush.msrb.mxu0 %v6132_v40 }
 0x1ac   : > { %1845 = vmatpush.msrb.mxu2 %v6133_v33  ;;  %1895 = vmatpush.msrb.mxu3 %v6134_v60 }
 0x1ad   : > { %1999 = vmatpush.msrb.mxu1 %v6128_v39  ;;  %1954 = vmatpush.msrb.mxu0 %v6135_v16 }
 0x1ae   : > { %1848 = vmatpush.msrb.mxu2 %v6136_v14  ;;  %2062 = vmatpush.msra.mxu3 %v6137_v8 }
 0x1af   : > { %2001 = vmatpush.msrb.mxu1 %v6131_v51  ;;  %1958 = vmatpush.msrb.mxu0 %v6138_v29 }
 0x1b0   : > { %1851 = vmatpush.msrb.mxu2 %v6139_v47  ;;  %2068 = vmatpush.msra.mxu3 %v6140_v62 }
 0x1b1   : > { %2003 = vmatpush.msrb.mxu1 %v6134_v60  ;;  %1962 = vmatpush.msrb.mxu0 %v6141_v43 }
 0x1b2   : > { %1854 = vmatpush.msrb.mxu2 %v6142_v6  ;;  %2074 = vmatpush.msra.mxu3 %v6143_v4 }
 0x1b3   : > { %1966 = vmatpush.msrb.mxu0 %v6144_v58 }
 0x1b4   : > { %1857 = vmatpush.msrb.mxu2 %v6145_v19  ;;  %2080 = vmatpush.msra.mxu3 %v6146_v0 }
 0x1b6   : > { %2017 = vmatpush.msra.mxu2 %v4760_v26  ;;  %2086 = vmatpush.msra.mxu3 %v6147_v20 }
 0x1b8   : > { %2019 = vmatpush.msra.mxu2 %v4769_v22  ;;  %2092 = vmatpush.msra.mxu3 %v6148_v1 }
 0x1ba   : > { %2021 = vmatpush.msra.mxu2 %v4784_v49  ;;  %2098 = vmatpush.msra.mxu3 %v6149_v31 }
 0x1bc   : > { %2023 = vmatpush.msra.mxu2 %v4795_v57  ;;  %2104 = vmatpush.msra.mxu3 %v6150_v44 }
 0x1be   : > { %2025 = vmatpush.msra.mxu2 %v4812_v52  ;;  %2110 = vmatpush.msra.mxu3 %v6151_v61 }
 0x1c0   : > { %2027 = vmatpush.msra.mxu2 %v4830_v32  ;;  %2116 = vmatpush.msra.mxu3 %v6152_v12 }
 0x1c2   : > { %2029 = vmatpush.msra.mxu2 %v4845_v17  ;;  %2122 = vmatpush.msra.mxu3 %v6153_v30 }
 0x1c4   : > { %2031 = vmatpush.msra.mxu2 %v4860_v25  ;;  %2128 = vmatpush.msra.mxu3 %v6154_v28 }
 0x1c6   : > { %2033 = vmatpush.msra.mxu2 %v4880_v7  ;;  %2134 = vmatpush.msra.mxu3 %v6155_v45 }
 0x1c8   : > { %2035 = vmatpush.msra.mxu2 %v4899_v50  ;;  %2140 = vmatpush.msra.mxu3 %v6156_v46 }
 0x1ca   : > { %2037 = vmatpush.msra.mxu2 %v4917_v5  ;;  %2146 = vmatpush.msra.mxu3 %v6157_v56 }
 0x1cc   : > { %2039 = vmatpush.msra.mxu2 %v4934_v18  ;;  %2152 = vmatpush.msra.mxu3 %v6158_v42  ;;  %v3949_v42 = vld [vmem:[%s4491_s18 + $0x8] sm:$0xff] }
 0x1ce   : > { %2041 = vmatpush.msra.mxu2 %v6125_v9 }
 0x1d0   : > { %2043 = vmatpush.msra.mxu2 %v6128_v39 }
 0x1d2   : > { %2045 = vmatpush.msra.mxu2 %v6131_v51 }
 0x1d4   : > { %2047 = vmatpush.msra.mxu2 %v6134_v60 }
 0x20c   : > { %v1513_v30 = vpop.f32.mrf.mxu0 }
 0x20e   : > { %v1552_v56 = vpop.f32.mrf.mxu1 }
 0x210   : > { %v1459_v45 = vpop.f32.mrf.mxu3 }
 0x218   : > { %v1358_v46 = vpop.f32.mrf.mxu2  ;;  %v1658_v1 = vpop.f32.mrf.mxu3 }
 0x219   : > { %v1460_v28 = vadd.f32 %v1459_v45, %v1358_v46  ;;  %v6169_v46 = vld [vmem:[#allocation54_spill] sm:$0xff] }
 0x21b   : > { %v1514_v12 = vadd.f32 %v1513_v30, %v1460_v28  ;;  %v6167_v30 = vld [vmem:[#allocation47_spill] sm:$0xff]  ;;  %v6168_v28 = vld [vmem:[#allocation50_spill] sm:$0xff] }
 0x21d   : > { %v1553_v61 = vadd.f32 %v1552_v56, %v1514_v12  ;;  %v6166_v12 = vld [vmem:[#allocation43_spill] sm:$0xff]  ;;  %v6170_v56 = vld [vmem:[#allocation56_spill] sm:$0xff] }
 0x220   : > { %v1621_v44 = vpop.f32.mrf.mxu2 }
 0x221   : > { %v1622_v31 = vadd.f32 %v1621_v44, %v1553_v61  ;;  %v6165_v61 = vld [vmem:[#allocation39_spill] sm:$0xff] }
 0x223   : > { %v1659_v20 = vadd.f32 %v1658_v1, %v1622_v31  ;;  %v6163_v1 = vld [vmem:[#allocation33_spill] sm:$0xff]  ;;  %v6164_v31 = vld [vmem:[#allocation34_spill] sm:$0xff] }
 0x225   : > { %v1661_v0 = vadd.f32 %v3949_v42, %v1659_v20  ;;  %v6162_v20 = vld [vmem:[#allocation30_spill] sm:$0xff] }
 0x226   : > { %v6171_v42 = vld [vmem:[#allocation58_spill] sm:$0xff] }
 0x227   : > { %4072 = vtanh.f32 %v1661_v0 }
 0x22d   : > { %v4073_v19 = vpop.eup %4072 }
 0x22e   : > { %3951 = vst [vmem:[%s5339_s17 + $0x8] sm:$0xff] %v4073_v19  ;;  %v1700_v58 = vand.u32 4294901760, %v4073_v19 }
 0x230   : > { %1806 = vmatmul.f32.vlgmr.msra.gmra.mxu1 %v1700_v58  ;;  %v1701_v4 = vsub.f32 %v4073_v19, %v1700_v58  ;;  %v6161_v19 = vld [vmem:[#allocation53_spill] sm:$0xff] }
 0x231   : > { %2213 = vmatpush.msra.mxu1 %v4760_v26 }
 0x232   : > { %1860 = vmatmul.f32.vlgmr.msrb.gmra.mxu2 %v1701_v4  ;;  %v1702_v45 = vand.u32 4294901760, %v1701_v4 }
 0x233   : > { %2215 = vmatpush.msra.mxu1 %v4769_v22  ;;  %2254 = vmatpush.msrb.mxu2 %v6120_v38 }
 0x234   : > { %1899 = vmatmul.f32.vlgmr.msrb.gmra.mxu3 %v1702_v45  ;;  %v1703_v44 = vsub.f32 %v1701_v4, %v1702_v45  ;;  %v6159_v4 = vld [vmem:[#allocation29_spill] sm:$0xff]  ;;  %v6172_v45 = vld [vmem:[#allocation59_spill] sm:$0xff] }
 0x235   : > { %2217 = vmatpush.msra.mxu1 %v4784_v49  ;;  %2321 = vmatpush.msrb.mxu3 %v4760_v26 }
 0x236   : > { %v1704_v0 = vand.u32 4294901760, %v1703_v44  ;;  %2258 = vmatpush.msrb.mxu2 %v6121_v41  ;;  %v6173_v44 = vld [vmem:[#allocation60_spill] sm:$0xff] }
 0x237   : > { %2219 = vmatpush.msra.mxu1 %v4795_v57  ;;  %2323 = vmatpush.msrb.mxu3 %v4769_v22 }
 0x238   : > { %1705 = vmatmul.f32.vlgmr.msra.gmra.mxu0 %v1704_v0  ;;  %2005 = vmatmul.f32.vlgmr.msrb.gmra.mxu1 %v1700_v58  ;;  %v6174_v0 = vld [vmem:[#allocation61_spill] sm:$0xff] }
 0x239   : > { %2160 = vmatpush.msra.mxu0 %v4767_v11  ;;  %2221 = vmatpush.msra.mxu1 %v4812_v52 }
 0x23a   : > { %2325 = vmatpush.msrb.mxu3 %v4784_v49  ;;  %2262 = vmatpush.msrb.mxu2 %v4822_v59 }
 0x23b   : > { %2163 = vmatpush.msra.mxu0 %v4782_v36  ;;  %2223 = vmatpush.msra.mxu1 %v4830_v32 }
 0x23c   : > { %2327 = vmatpush.msrb.mxu3 %v4795_v57  ;;  %2266 = vmatpush.msrb.mxu2 %v4828_v10 }
 0x23d   : > { %2166 = vmatpush.msra.mxu0 %v4805_v37  ;;  %2225 = vmatpush.msra.mxu1 %v4845_v17 }
 0x23e   : > { %2329 = vmatpush.msrb.mxu3 %v4812_v52  ;;  %2270 = vmatpush.msrb.mxu2 %v4854_v54 }
 0x23f   : > { %2169 = vmatpush.msra.mxu0 %v4815_v55  ;;  %2227 = vmatpush.msra.mxu1 %v4860_v25 }
 0x240   : > { %1968 = vmatmul.f32.vlgmr.msrb.gmra.mxu0 %v1700_v58  ;;  %2331 = vmatpush.msrb.mxu3 %v4830_v32  ;;  %v6160_v58 = vld [vmem:[#allocation57_spill] sm:$0xff] }
 0x241   : > { %2172 = vmatpush.msra.mxu0 %v6122_v34  ;;  %2229 = vmatpush.msra.mxu1 %v4880_v7 }
 0x242   : > { %2333 = vmatpush.msrb.mxu3 %v4845_v17  ;;  %2274 = vmatpush.msrb.mxu2 %v4869_v15 }
 0x243   : > { %2175 = vmatpush.msra.mxu0 %v6123_v63  ;;  %2231 = vmatpush.msra.mxu1 %v4899_v50 }
 0x244   : > { %2335 = vmatpush.msrb.mxu3 %v4860_v25  ;;  %2278 = vmatpush.msrb.mxu2 %v4892_v13 }
 0x245   : > { %2178 = vmatpush.msra.mxu0 %v4872_v48  ;;  %2233 = vmatpush.msra.mxu1 %v4917_v5 }
 0x246   : > { %2337 = vmatpush.msrb.mxu3 %v4880_v7  ;;  %2282 = vmatpush.msrb.mxu2 %v4909_v23 }
 0x247   : > { %2181 = vmatpush.msra.mxu0 %v4883_v3  ;;  %2235 = vmatpush.msra.mxu1 %v4934_v18 }
 0x248   : > { %2339 = vmatpush.msrb.mxu3 %v4899_v50  ;;  %2286 = vmatpush.msrb.mxu2 %v4929_v2 }
 0x249   : > { %2184 = vmatpush.msra.mxu0 %v6124_v24  ;;  %2237 = vmatpush.msra.mxu1 %v6125_v9 }
 0x24a   : > { %2341 = vmatpush.msrb.mxu3 %v4917_v5  ;;  %2290 = vmatpush.msrb.mxu2 %v6126_v21 }
 0x24b   : > { %2187 = vmatpush.msra.mxu0 %v6127_v35  ;;  %2239 = vmatpush.msra.mxu1 %v6128_v39 }
 0x24c   : > { %2343 = vmatpush.msrb.mxu3 %v4934_v18  ;;  %2294 = vmatpush.msrb.mxu2 %v6129_v53 }
 0x24d   : > { %2190 = vmatpush.msra.mxu0 %v6130_v27  ;;  %2241 = vmatpush.msra.mxu1 %v6131_v51 }
 0x24e   : > { %2345 = vmatpush.msrb.mxu3 %v6125_v9  ;;  %2298 = vmatpush.msrb.mxu2 %v6132_v40 }
 0x24f   : > { %2193 = vmatpush.msra.mxu0 %v6133_v33  ;;  %2243 = vmatpush.msra.mxu1 %v6134_v60 }
 0x250   : > { %2347 = vmatpush.msrb.mxu3 %v6128_v39  ;;  %2302 = vmatpush.msrb.mxu2 %v6135_v16 }
 0x251   : > { %2196 = vmatpush.msra.mxu0 %v6136_v14  ;;  %2410 = vmatpush.msrb.mxu1 %v6137_v8 }
 0x252   : > { %2349 = vmatpush.msrb.mxu3 %v6131_v51  ;;  %2306 = vmatpush.msrb.mxu2 %v6138_v29 }
 0x253   : > { %2199 = vmatpush.msra.mxu0 %v6139_v47  ;;  %2416 = vmatpush.msrb.mxu1 %v6140_v62 }
 0x254   : > { %2351 = vmatpush.msrb.mxu3 %v6134_v60  ;;  %2310 = vmatpush.msrb.mxu2 %v6141_v43 }
 0x255   : > { %2202 = vmatpush.msra.mxu0 %v6142_v6  ;;  %2422 = vmatpush.msrb.mxu1 %v6159_v4 }
 0x256   : > { %2314 = vmatpush.msrb.mxu2 %v6160_v58 }
 0x257   : > { %2205 = vmatpush.msra.mxu0 %v6161_v19  ;;  %2428 = vmatpush.msrb.mxu1 %v6162_v20 }
 0x259   : > { %2365 = vmatpush.msrb.mxu0 %v4760_v26  ;;  %2434 = vmatpush.msrb.mxu1 %v6163_v1 }
 0x25b   : > { %2367 = vmatpush.msrb.mxu0 %v4769_v22  ;;  %2440 = vmatpush.msrb.mxu1 %v6164_v31 }
 0x25d   : > { %2369 = vmatpush.msrb.mxu0 %v4784_v49  ;;  %2446 = vmatpush.msrb.mxu1 %v6165_v61 }
 0x25f   : > { %2371 = vmatpush.msrb.mxu0 %v4795_v57  ;;  %2452 = vmatpush.msrb.mxu1 %v6166_v12 }
 0x261   : > { %2373 = vmatpush.msrb.mxu0 %v4812_v52  ;;  %2458 = vmatpush.msrb.mxu1 %v6167_v30 }
 0x263   : > { %2375 = vmatpush.msrb.mxu0 %v4830_v32  ;;  %2464 = vmatpush.msrb.mxu1 %v6168_v28 }
 0x265   : > { %2377 = vmatpush.msrb.mxu0 %v4845_v17  ;;  %2470 = vmatpush.msrb.mxu1 %v6169_v46 }
 0x267   : > { %2379 = vmatpush.msrb.mxu0 %v4860_v25  ;;  %2476 = vmatpush.msrb.mxu1 %v6170_v56 }
 0x269   : > { %2381 = vmatpush.msrb.mxu0 %v4880_v7  ;;  %2482 = vmatpush.msrb.mxu1 %v6171_v42 }
 0x26b   : > { %2383 = vmatpush.msrb.mxu0 %v4899_v50  ;;  %2488 = vmatpush.msrb.mxu1 %v6172_v45 }
 0x26d   : > { %2385 = vmatpush.msrb.mxu0 %v4917_v5  ;;  %2494 = vmatpush.msrb.mxu1 %v6173_v44 }
 0x26f   : > { %2387 = vmatpush.msrb.mxu0 %v4934_v18  ;;  %2500 = vmatpush.msrb.mxu1 %v6174_v0  ;;  %v3952_v0 = vld [vmem:[%s4491_s18 + $0x10] sm:$0xff] }
 0x271   : > { %2389 = vmatpush.msrb.mxu0 %v6125_v9 }
 0x273   : > { %2391 = vmatpush.msrb.mxu0 %v6128_v39 }
 0x275   : > { %2393 = vmatpush.msrb.mxu0 %v6131_v51 }
 0x277   : > { %2395 = vmatpush.msrb.mxu0 %v6134_v60 }
 0x2ad   : > { %v1807_v42 = vpop.f32.mrf.mxu1 }
 0x2b5   : > { %v1706_v45 = vpop.f32.mrf.mxu0  ;;  %v1861_v46 = vpop.f32.mrf.mxu2 }
 0x2b6   : > { %v1808_v56 = vadd.f32 %v1807_v42, %v1706_v45  ;;  %v2006_v31 = vpop.f32.mrf.mxu1  ;;  %v6185_v45 = vld [vmem:[#allocation54_spill] sm:$0xff] }
 0x2b7   : > { %v1900_v44 = vpop.f32.mrf.mxu3 }
 0x2b8   : > { %v1862_v28 = vadd.f32 %v1861_v46, %v1808_v56  ;;  %v6183_v46 = vld [vmem:[#allocation47_spill] sm:$0xff]  ;;  %v6184_v56 = vld [vmem:[#allocation50_spill] sm:$0xff] }
 0x2ba   : > { %v1901_v30 = vadd.f32 %v1900_v44, %v1862_v28  ;;  %v6182_v28 = vld [vmem:[#allocation43_spill] sm:$0xff]  ;;  %v6186_v44 = vld [vmem:[#allocation56_spill] sm:$0xff] }
 0x2bd   : > { %v1969_v12 = vpop.f32.mrf.mxu0 }
 0x2be   : > { %v1970_v61 = vadd.f32 %v1969_v12, %v1901_v30  ;;  %v6181_v30 = vld [vmem:[#allocation39_spill] sm:$0xff] }
 0x2c0   : > { %v2007_v1 = vadd.f32 %v2006_v31, %v1970_v61  ;;  %v6179_v31 = vld [vmem:[#allocation33_spill] sm:$0xff]  ;;  %v6180_v61 = vld [vmem:[#allocation34_spill] sm:$0xff] }
 0x2c2   : > { %v2009_v20 = vadd.f32 %v3952_v0, %v2007_v1  ;;  %v6178_v1 = vld [vmem:[#allocation30_spill] sm:$0xff] }
 0x2c3   : > { %v6187_v0 = vld [vmem:[#allocation58_spill] sm:$0xff] }
 0x2c4   : > { %4074 = vtanh.f32 %v2009_v20 }
 0x2ca   : > { %v4075_v19 = vpop.eup %4074 }
 0x2cb   : > { %3954 = vst [vmem:[%s5339_s17 + $0x10] sm:$0xff] %v4075_v19  ;;  %v2048_v58 = vand.u32 4294901760, %v4075_v19 }
 0x2cd   : > { %2154 = vmatmul.f32.vlgmr.msra.gmra.mxu3 %v2048_v58  ;;  %v2049_v4 = vsub.f32 %v4075_v19, %v2048_v58  ;;  %v6177_v19 = vld [vmem:[#allocation53_spill] sm:$0xff] }
 0x2ce   : > { %2561 = vmatpush.msra.mxu3 %v4760_v26 }
 0x2cf   : > { %2208 = vmatmul.f32.vlgmr.msra.gmra.mxu0 %v2049_v4  ;;  %v2050_v42 = vand.u32 4294901760, %v2049_v4 }
 0x2d0   : > { %2563 = vmatpush.msra.mxu3 %v4769_v22  ;;  %2602 = vmatpush.msra.mxu0 %v6120_v38 }
 0x2d1   : > { %2247 = vmatmul.f32.vlgmr.msra.gmra.mxu1 %v2050_v42  ;;  %v2051_v12 = vsub.f32 %v2049_v4, %v2050_v42  ;;  %v6175_v4 = vld [vmem:[#allocation29_spill] sm:$0xff]  ;;  %v6188_v42 = vld [vmem:[#allocation59_spill] sm:$0xff] }
 0x2d2   : > { %2565 = vmatpush.msra.mxu3 %v4784_v49  ;;  %2669 = vmatpush.msra.mxu1 %v4760_v26 }
 0x2d3   : > { %v2052_v20 = vand.u32 4294901760, %v2051_v12  ;;  %2606 = vmatpush.msra.mxu0 %v6121_v41  ;;  %v6189_v12 = vld [vmem:[#allocation60_spill] sm:$0xff] }
 0x2d4   : > { %2567 = vmatpush.msra.mxu3 %v4795_v57  ;;  %2671 = vmatpush.msra.mxu1 %v4769_v22 }
 0x2d5   : > { %2053 = vmatmul.f32.vlgmr.msra.gmra.mxu2 %v2052_v20  ;;  %2353 = vmatmul.f32.vlgmr.msrb.gmra.mxu3 %v2048_v58  ;;  %v6190_v20 = vld [vmem:[#allocation61_spill] sm:$0xff] }
 0x2d6   : > { %2508 = vmatpush.msra.mxu2 %v4767_v11  ;;  %2569 = vmatpush.msra.mxu3 %v4812_v52 }
 0x2d7   : > { %2673 = vmatpush.msra.mxu1 %v4784_v49  ;;  %2610 = vmatpush.msra.mxu0 %v4822_v59 }
 0x2d8   : > { %2511 = vmatpush.msra.mxu2 %v4782_v36  ;;  %2571 = vmatpush.msra.mxu3 %v4830_v32 }
 0x2d9   : > { %2675 = vmatpush.msra.mxu1 %v4795_v57  ;;  %2614 = vmatpush.msra.mxu0 %v4828_v10 }
 0x2da   : > { %2514 = vmatpush.msra.mxu2 %v4805_v37  ;;  %2573 = vmatpush.msra.mxu3 %v4845_v17 }
 0x2db   : > { %2677 = vmatpush.msra.mxu1 %v4812_v52  ;;  %2618 = vmatpush.msra.mxu0 %v4854_v54 }
 0x2dc   : > { %2517 = vmatpush.msra.mxu2 %v4815_v55  ;;  %2575 = vmatpush.msra.mxu3 %v4860_v25 }
 0x2dd   : > { %2316 = vmatmul.f32.vlgmr.msrb.gmra.mxu2 %v2048_v58  ;;  %2679 = vmatpush.msra.mxu1 %v4830_v32  ;;  %v6176_v58 = vld [vmem:[#allocation57_spill] sm:$0xff] }
 0x2de   : > { %2520 = vmatpush.msra.mxu2 %v6122_v34  ;;  %2577 = vmatpush.msra.mxu3 %v4880_v7 }
 0x2df   : > { %2681 = vmatpush.msra.mxu1 %v4845_v17  ;;  %2622 = vmatpush.msra.mxu0 %v4869_v15 }
 0x2e0   : > { %2523 = vmatpush.msra.mxu2 %v6123_v63  ;;  %2579 = vmatpush.msra.mxu3 %v4899_v50 }
 0x2e1   : > { %2683 = vmatpush.msra.mxu1 %v4860_v25  ;;  %2626 = vmatpush.msra.mxu0 %v4892_v13 }
 0x2e2   : > { %2526 = vmatpush.msra.mxu2 %v4872_v48  ;;  %2581 = vmatpush.msra.mxu3 %v4917_v5 }
 0x2e3   : > { %2685 = vmatpush.msra.mxu1 %v4880_v7  ;;  %2630 = vmatpush.msra.mxu0 %v4909_v23 }
 0x2e4   : > { %2529 = vmatpush.msra.mxu2 %v4883_v3  ;;  %2583 = vmatpush.msra.mxu3 %v4934_v18 }
 0x2e5   : > { %2687 = vmatpush.msra.mxu1 %v4899_v50  ;;  %2634 = vmatpush.msra.mxu0 %v4929_v2 }
 0x2e6   : > { %2532 = vmatpush.msra.mxu2 %v6124_v24  ;;  %2585 = vmatpush.msra.mxu3 %v6125_v9 }
 0x2e7   : > { %2689 = vmatpush.msra.mxu1 %v4917_v5  ;;  %2638 = vmatpush.msra.mxu0 %v6126_v21 }
 0x2e8   : > { %2535 = vmatpush.msra.mxu2 %v6127_v35  ;;  %2587 = vmatpush.msra.mxu3 %v6128_v39 }
 0x2e9   : > { %2691 = vmatpush.msra.mxu1 %v4934_v18  ;;  %2642 = vmatpush.msra.mxu0 %v6129_v53 }
 0x2ea   : > { %2538 = vmatpush.msra.mxu2 %v6130_v27  ;;  %2589 = vmatpush.msra.mxu3 %v6131_v51 }
 0x2eb   : > { %2693 = vmatpush.msra.mxu1 %v6125_v9  ;;  %2646 = vmatpush.msra.mxu0 %v6132_v40 }
 0x2ec   : > { %2541 = vmatpush.msra.mxu2 %v6133_v33  ;;  %2591 = vmatpush.msra.mxu3 %v6134_v60 }
 0x2ed   : > { %2695 = vmatpush.msra.mxu1 %v6128_v39  ;;  %2650 = vmatpush.msra.mxu0 %v6135_v16 }
 0x2ee   : > { %2544 = vmatpush.msra.mxu2 %v6136_v14  ;;  %2758 = vmatpush.msrb.mxu3 %v6137_v8 }
 0x2ef   : > { %2697 = vmatpush.msra.mxu1 %v6131_v51  ;;  %2654 = vmatpush.msra.mxu0 %v6138_v29 }
 0x2f0   : > { %2547 = vmatpush.msra.mxu2 %v6139_v47  ;;  %2764 = vmatpush.msrb.mxu3 %v6140_v62 }
 0x2f1   : > { %2699 = vmatpush.msra.mxu1 %v6134_v60  ;;  %2658 = vmatpush.msra.mxu0 %v6141_v43 }
 0x2f2   : > { %2550 = vmatpush.msra.mxu2 %v6142_v6  ;;  %2770 = vmatpush.msrb.mxu3 %v6175_v4 }
 0x2f3   : > { %2662 = vmatpush.msra.mxu0 %v6176_v58 }
 0x2f4   : > { %2553 = vmatpush.msra.mxu2 %v6177_v19  ;;  %2776 = vmatpush.msrb.mxu3 %v6178_v1 }
 0x2f6   : > { %2713 = vmatpush.msrb.mxu2 %v4760_v26  ;;  %2782 = vmatpush.msrb.mxu3 %v6179_v31 }
 0x2f8   : > { %2715 = vmatpush.msrb.mxu2 %v4769_v22  ;;  %2788 = vmatpush.msrb.mxu3 %v6180_v61 }
 0x2fa   : > { %2717 = vmatpush.msrb.mxu2 %v4784_v49  ;;  %2794 = vmatpush.msrb.mxu3 %v6181_v30 }
 0x2fc   : > { %2719 = vmatpush.msrb.mxu2 %v4795_v57  ;;  %2800 = vmatpush.msrb.mxu3 %v6182_v28 }
 0x2fe   : > { %2721 = vmatpush.msrb.mxu2 %v4812_v52  ;;  %2806 = vmatpush.msrb.mxu3 %v6183_v46 }
 0x300   : > { %2723 = vmatpush.msrb.mxu2 %v4830_v32  ;;  %2812 = vmatpush.msrb.mxu3 %v6184_v56 }
 0x302   : > { %2725 = vmatpush.msrb.mxu2 %v4845_v17  ;;  %2818 = vmatpush.msrb.mxu3 %v6185_v45 }
 0x304   : > { %2727 = vmatpush.msrb.mxu2 %v4860_v25  ;;  %2824 = vmatpush.msrb.mxu3 %v6186_v44 }
 0x306   : > { %2729 = vmatpush.msrb.mxu2 %v4880_v7  ;;  %2830 = vmatpush.msrb.mxu3 %v6187_v0 }
 0x308   : > { %2731 = vmatpush.msrb.mxu2 %v4899_v50  ;;  %2836 = vmatpush.msrb.mxu3 %v6188_v42 }
 0x30a   : > { %2733 = vmatpush.msrb.mxu2 %v4917_v5  ;;  %2842 = vmatpush.msrb.mxu3 %v6189_v12 }
 0x30c   : > { %2735 = vmatpush.msrb.mxu2 %v4934_v18  ;;  %2848 = vmatpush.msrb.mxu3 %v6190_v20  ;;  %v3955_v20 = vld [vmem:[%s4491_s18 + $0x18] sm:$0xff] }
 0x30e   : > { %2737 = vmatpush.msrb.mxu2 %v6125_v9 }
 0x310   : > { %2739 = vmatpush.msrb.mxu2 %v6128_v39 }
 0x312   : > { %2741 = vmatpush.msrb.mxu2 %v6131_v51 }
 0x314   : > { %2743 = vmatpush.msrb.mxu2 %v6134_v60 }
 0x34c   : > { %v2209_v45 = vpop.f32.mrf.mxu0 }
 0x34e   : > { %v2248_v12 = vpop.f32.mrf.mxu1 }
 0x350   : > { %v2155_v0 = vpop.f32.mrf.mxu3 }
 0x358   : > { %v2054_v42 = vpop.f32.mrf.mxu2  ;;  %v2354_v61 = vpop.f32.mrf.mxu3 }
 0x359   : > { %v2156_v44 = vadd.f32 %v2155_v0, %v2054_v42  ;;  %v6201_v42 = vld [vmem:[#allocation54_spill] sm:$0xff] }
 0x35b   : > { %v2210_v56 = vadd.f32 %v2209_v45, %v2156_v44  ;;  %v6199_v45 = vld [vmem:[#allocation47_spill] sm:$0xff]  ;;  %v6200_v44 = vld [vmem:[#allocation50_spill] sm:$0xff] }
 0x35d   : > { %v2249_v46 = vadd.f32 %v2248_v12, %v2210_v56  ;;  %v6198_v56 = vld [vmem:[#allocation43_spill] sm:$0xff]  ;;  %v6202_v12 = vld [vmem:[#allocation56_spill] sm:$0xff] }
 0x360   : > { %v2317_v28 = vpop.f32.mrf.mxu2 }
 0x361   : > { %v2318_v30 = vadd.f32 %v2317_v28, %v2249_v46  ;;  %v6197_v46 = vld [vmem:[#allocation39_spill] sm:$0xff] }
 0x363   : > { %v2355_v31 = vadd.f32 %v2354_v61, %v2318_v30  ;;  %v6195_v61 = vld [vmem:[#allocation33_spill] sm:$0xff]  ;;  %v6196_v30 = vld [vmem:[#allocation34_spill] sm:$0xff] }
 0x365   : > { %v2357_v1 = vadd.f32 %v3955_v20, %v2355_v31  ;;  %v6194_v31 = vld [vmem:[#allocation30_spill] sm:$0xff] }
 0x366   : > { %v6203_v20 = vld [vmem:[#allocation58_spill] sm:$0xff] }
 0x367   : > { %4076 = vtanh.f32 %v2357_v1 }
 0x36d   : > { %v4077_v19 = vpop.eup %4076 }
 0x36e   : > { %3957 = vst [vmem:[%s5339_s17 + $0x18] sm:$0xff] %v4077_v19  ;;  %v2396_v58 = vand.u32 4294901760, %v4077_v19 }
 0x370   : > { %2502 = vmatmul.f32.vlgmr.msrb.gmra.mxu1 %v2396_v58  ;;  %v2397_v4 = vsub.f32 %v4077_v19, %v2396_v58  ;;  %v6193_v19 = vld [vmem:[#allocation53_spill] sm:$0xff] }
 0x371   : > { %2909 = vmatpush.msrb.mxu1 %v4760_v26 }
 0x372   : > { %2556 = vmatmul.f32.vlgmr.msra.gmra.mxu2 %v2397_v4  ;;  %v2398_v0 = vand.u32 4294901760, %v2397_v4 }
 0x373   : > { %2911 = vmatpush.msrb.mxu1 %v4769_v22  ;;  %2950 = vmatpush.msra.mxu2 %v6120_v38 }
 0x374   : > { %2595 = vmatmul.f32.vlgmr.msra.gmra.mxu3 %v2398_v0  ;;  %v2399_v28 = vsub.f32 %v2397_v4, %v2398_v0  ;;  %v6191_v4 = vld [vmem:[#allocation29_spill] sm:$0xff]  ;;  %v6204_v0 = vld [vmem:[#allocation59_spill] sm:$0xff] }
 0x375   : > { %2913 = vmatpush.msrb.mxu1 %v4784_v49  ;;  %3017 = vmatpush.msra.mxu3 %v4760_v26 }
 0x376   : > { %v2400_v1 = vand.u32 4294901760, %v2399_v28  ;;  %2954 = vmatpush.msra.mxu2 %v6121_v41  ;;  %v6205_v28 = vld [vmem:[#allocation60_spill] sm:$0xff] }
 0x377   : > { %2915 = vmatpush.msrb.mxu1 %v4795_v57  ;;  %3019 = vmatpush.msra.mxu3 %v4769_v22 }
 0x378   : > { %2401 = vmatmul.f32.vlgmr.msrb.gmra.mxu0 %v2400_v1  ;;  %2701 = vmatmul.f32.vlgmr.msra.gmra.mxu1 %v2396_v58  ;;  %v6206_v1 = vld [vmem:[#allocation61_spill] sm:$0xff] }
 0x379   : > { %2856 = vmatpush.msrb.mxu0 %v4767_v11  ;;  %2917 = vmatpush.msrb.mxu1 %v4812_v52 }
 0x37a   : > { %3021 = vmatpush.msra.mxu3 %v4784_v49  ;;  %2958 = vmatpush.msra.mxu2 %v4822_v59 }
 0x37b   : > { %2859 = vmatpush.msrb.mxu0 %v4782_v36  ;;  %2919 = vmatpush.msrb.mxu1 %v4830_v32 }
 0x37c   : > { %3023 = vmatpush.msra.mxu3 %v4795_v57  ;;  %2962 = vmatpush.msra.mxu2 %v4828_v10 }
 0x37d   : > { %2862 = vmatpush.msrb.mxu0 %v4805_v37  ;;  %2921 = vmatpush.msrb.mxu1 %v4845_v17 }
 0x37e   : > { %3025 = vmatpush.msra.mxu3 %v4812_v52  ;;  %2966 = vmatpush.msra.mxu2 %v4854_v54 }
 0x37f   : > { %2865 = vmatpush.msrb.mxu0 %v4815_v55  ;;  %2923 = vmatpush.msrb.mxu1 %v4860_v25 }
 0x380   : > { %2664 = vmatmul.f32.vlgmr.msra.gmra.mxu0 %v2396_v58  ;;  %3027 = vmatpush.msra.mxu3 %v4830_v32  ;;  %v6192_v58 = vld [vmem:[#allocation57_spill] sm:$0xff] }
 0x381   : > { %2868 = vmatpush.msrb.mxu0 %v6122_v34  ;;  %2925 = vmatpush.msrb.mxu1 %v4880_v7 }
 0x382   : > { %3029 = vmatpush.msra.mxu3 %v4845_v17  ;;  %2970 = vmatpush.msra.mxu2 %v4869_v15 }
 0x383   : > { %2871 = vmatpush.msrb.mxu0 %v6123_v63  ;;  %2927 = vmatpush.msrb.mxu1 %v4899_v50 }
 0x384   : > { %3031 = vmatpush.msra.mxu3 %v4860_v25  ;;  %2974 = vmatpush.msra.mxu2 %v4892_v13 }
 0x385   : > { %2874 = vmatpush.msrb.mxu0 %v4872_v48  ;;  %2929 = vmatpush.msrb.mxu1 %v4917_v5 }
 0x386   : > { %3033 = vmatpush.msra.mxu3 %v4880_v7  ;;  %2978 = vmatpush.msra.mxu2 %v4909_v23 }
 0x387   : > { %2877 = vmatpush.msrb.mxu0 %v4883_v3  ;;  %2931 = vmatpush.msrb.mxu1 %v4934_v18 }
 0x388   : > { %3035 = vmatpush.msra.mxu3 %v4899_v50  ;;  %2982 = vmatpush.msra.mxu2 %v4929_v2 }
 0x389   : > { %2880 = vmatpush.msrb.mxu0 %v6124_v24  ;;  %2933 = vmatpush.msrb.mxu1 %v6125_v9 }
 0x38a   : > { %3037 = vmatpush.msra.mxu3 %v4917_v5  ;;  %2986 = vmatpush.msra.mxu2 %v6126_v21 }
 0x38b   : > { %2883 = vmatpush.msrb.mxu0 %v6127_v35  ;;  %2935 = vmatpush.msrb.mxu1 %v6128_v39 }
 0x38c   : > { %3039 = vmatpush.msra.mxu3 %v4934_v18  ;;  %2990 = vmatpush.msra.mxu2 %v6129_v53 }
 0x38d   : > { %2886 = vmatpush.msrb.mxu0 %v6130_v27  ;;  %2937 = vmatpush.msrb.mxu1 %v6131_v51 }
 0x38e   : > { %3041 = vmatpush.msra.mxu3 %v6125_v9  ;;  %2994 = vmatpush.msra.mxu2 %v6132_v40 }
 0x38f   : > { %2889 = vmatpush.msrb.mxu0 %v6133_v33  ;;  %2939 = vmatpush.msrb.mxu1 %v6134_v60 }
 0x390   : > { %3043 = vmatpush.msra.mxu3 %v6128_v39  ;;  %2998 = vmatpush.msra.mxu2 %v6135_v16 }
 0x391   : > { %2892 = vmatpush.msrb.mxu0 %v6136_v14  ;;  %3106 = vmatpush.msra.mxu1 %v6137_v8 }
 0x392   : > { %3045 = vmatpush.msra.mxu3 %v6131_v51  ;;  %3002 = vmatpush.msra.mxu2 %v6138_v29 }
 0x393   : > { %2895 = vmatpush.msrb.mxu0 %v6139_v47  ;;  %3112 = vmatpush.msra.mxu1 %v6140_v62 }
 0x394   : > { %3047 = vmatpush.msra.mxu3 %v6134_v60  ;;  %3006 = vmatpush.msra.mxu2 %v6141_v43 }
 0x395   : > { %2898 = vmatpush.msrb.mxu0 %v6142_v6  ;;  %3118 = vmatpush.msra.mxu1 %v6191_v4 }
 0x396   : > { %3010 = vmatpush.msra.mxu2 %v6192_v58 }
 0x397   : > { %2901 = vmatpush.msrb.mxu0 %v6193_v19  ;;  %3124 = vmatpush.msra.mxu1 %v6194_v31 }
 0x399   : > { %3061 = vmatpush.msra.mxu0 %v4760_v26  ;;  %3130 = vmatpush.msra.mxu1 %v6195_v61 }
 0x39b   : > { %3063 = vmatpush.msra.mxu0 %v4769_v22  ;;  %3136 = vmatpush.msra.mxu1 %v6196_v30 }
 0x39d   : > { %3065 = vmatpush.msra.mxu0 %v4784_v49  ;;  %3142 = vmatpush.msra.mxu1 %v6197_v46 }
 0x39f   : > { %3067 = vmatpush.msra.mxu0 %v4795_v57  ;;  %3148 = vmatpush.msra.mxu1 %v6198_v56 }
 0x3a1   : > { %3069 = vmatpush.msra.mxu0 %v4812_v52  ;;  %3154 = vmatpush.msra.mxu1 %v6199_v45 }
 0x3a3   : > { %3071 = vmatpush.msra.mxu0 %v4830_v32  ;;  %3160 = vmatpush.msra.mxu1 %v6200_v44 }
 0x3a5   : > { %3073 = vmatpush.msra.mxu0 %v4845_v17  ;;  %3166 = vmatpush.msra.mxu1 %v6201_v42 }
 0x3a7   : > { %3075 = vmatpush.msra.mxu0 %v4860_v25  ;;  %3172 = vmatpush.msra.mxu1 %v6202_v12 }
 0x3a9   : > { %3077 = vmatpush.msra.mxu0 %v4880_v7  ;;  %3178 = vmatpush.msra.mxu1 %v6203_v20 }
 0x3ab   : > { %3079 = vmatpush.msra.mxu0 %v4899_v50  ;;  %3184 = vmatpush.msra.mxu1 %v6204_v0 }
 0x3ad   : > { %3081 = vmatpush.msra.mxu0 %v4917_v5  ;;  %3190 = vmatpush.msra.mxu1 %v6205_v28 }
 0x3af   : > { %3083 = vmatpush.msra.mxu0 %v4934_v18  ;;  %3196 = vmatpush.msra.mxu1 %v6206_v1  ;;  %v3958_v1 = vld [vmem:[%s4491_s18 + $0x20] sm:$0xff] }
 0x3b1   : > { %3085 = vmatpush.msra.mxu0 %v6125_v9 }
 0x3b3   : > { %3087 = vmatpush.msra.mxu0 %v6128_v39 }
 0x3b5   : > { %3089 = vmatpush.msra.mxu0 %v6131_v51 }
 0x3b7   : > { %3091 = vmatpush.msra.mxu0 %v6134_v60 }
 0x3ed   : > { %v2503_v20 = vpop.f32.mrf.mxu1 }
 0x3f5   : > { %v2402_v0 = vpop.f32.mrf.mxu0  ;;  %v2557_v42 = vpop.f32.mrf.mxu2 }
 0x3f6   : > { %v2504_v12 = vadd.f32 %v2503_v20, %v2402_v0  ;;  %v2702_v30 = vpop.f32.mrf.mxu1  ;;  %v6219_v0 = vld [vmem:[#allocation58_spill] sm:$0xff] }
 0x3f7   : > { %v2596_v28 = vpop.f32.mrf.mxu3 }
 0x3f8   : > { %v2558_v44 = vadd.f32 %v2557_v42, %v2504_v12  ;;  %v6217_v42 = vld [vmem:[#allocation54_spill] sm:$0xff]  ;;  %v6218_v12 = vld [vmem:[#allocation56_spill] sm:$0xff] }
 0x3fa   : > { %v2597_v45 = vadd.f32 %v2596_v28, %v2558_v44  ;;  %v6216_v44 = vld [vmem:[#allocation50_spill] sm:$0xff]  ;;  %v6220_v28 = vld [vmem:[#allocation59_spill] sm:$0xff] }
 0x3fd   : > { %v2665_v56 = vpop.f32.mrf.mxu0 }
 0x3fe   : > { %v2666_v46 = vadd.f32 %v2665_v56, %v2597_v45  ;;  %v6215_v45 = vld [vmem:[#allocation47_spill] sm:$0xff] }
 0x400   : > { %v2703_v61 = vadd.f32 %v2702_v30, %v2666_v46  ;;  %v6213_v30 = vld [vmem:[#allocation39_spill] sm:$0xff] }
 0x401   : > { %v6214_v46 = vld [vmem:[#allocation43_spill] sm:$0xff] }
 0x402   : > { %v2705_v31 = vadd.f32 %v3958_v1, %v2703_v61  ;;  %v6211_v61 = vld [vmem:[#allocation33_spill] sm:$0xff]  ;;  %v6221_v1 = vld [vmem:[#allocation60_spill] sm:$0xff] }
 0x404   : > { %4078 = vtanh.f32 %v2705_v31 }
 0x40a   : > { %v4079_v19 = vpop.eup %4078 }
 0x40b   : > { %3960 = vst [vmem:[%s5339_s17 + $0x20] sm:$0xff] %v4079_v19  ;;  %v2744_v58 = vand.u32 4294901760, %v4079_v19 }
 0x40d   : > { %2850 = vmatmul.f32.vlgmr.msrb.gmra.mxu3 %v2744_v58  ;;  %v2745_v4 = vsub.f32 %v4079_v19, %v2744_v58  ;;  %v6209_v19 = vld [vmem:[#allocation53_spill] sm:$0xff] }
 0x40e   : > { %3257 = vmatpush.msrb.mxu3 %v4760_v26 }
 0x40f   : > { %2904 = vmatmul.f32.vlgmr.msrb.gmra.mxu0 %v2745_v4  ;;  %v2746_v20 = vand.u32 4294901760, %v2745_v4 }
 0x410   : > { %3259 = vmatpush.msrb.mxu3 %v4769_v22  ;;  %3298 = vmatpush.msrb.mxu0 %v6120_v38 }
 0x411   : > { %2943 = vmatmul.f32.vlgmr.msrb.gmra.mxu1 %v2746_v20  ;;  %v2747_v56 = vsub.f32 %v2745_v4, %v2746_v20  ;;  %v6207_v4 = vld [vmem:[#allocation29_spill] sm:$0xff] }
 0x412   : > { %3261 = vmatpush.msrb.mxu3 %v4784_v49  ;;  %3365 = vmatpush.msrb.mxu1 %v4760_v26  ;;  %v6222_v20 = vld [vmem:[#allocation61_spill] sm:$0xff] }
 0x413   : > { %v2748_v31 = vand.u32 4294901760, %v2747_v56  ;;  %3302 = vmatpush.msrb.mxu0 %v6121_v41 }
 0x414   : > { %3263 = vmatpush.msrb.mxu3 %v4795_v57  ;;  %3367 = vmatpush.msrb.mxu1 %v4769_v22 }
 0x415   : > { %2749 = vmatmul.f32.vlgmr.msrb.gmra.mxu2 %v2748_v31  ;;  %3049 = vmatmul.f32.vlgmr.msra.gmra.mxu3 %v2744_v58 }
 0x416   : > { %3204 = vmatpush.msrb.mxu2 %v4767_v11  ;;  %3265 = vmatpush.msrb.mxu3 %v4812_v52 }
 0x417   : > { %3369 = vmatpush.msrb.mxu1 %v4784_v49  ;;  %3306 = vmatpush.msrb.mxu0 %v4822_v59 }
 0x418   : > { %3207 = vmatpush.msrb.mxu2 %v4782_v36  ;;  %3267 = vmatpush.msrb.mxu3 %v4830_v32 }
 0x419   : > { %3371 = vmatpush.msrb.mxu1 %v4795_v57  ;;  %3310 = vmatpush.msrb.mxu0 %v4828_v10 }
 0x41a   : > { %3210 = vmatpush.msrb.mxu2 %v4805_v37  ;;  %3269 = vmatpush.msrb.mxu3 %v4845_v17 }
 0x41b   : > { %3373 = vmatpush.msrb.mxu1 %v4812_v52  ;;  %3314 = vmatpush.msrb.mxu0 %v4854_v54 }
 0x41c   : > { %3213 = vmatpush.msrb.mxu2 %v4815_v55  ;;  %3271 = vmatpush.msrb.mxu3 %v4860_v25 }
 0x41d   : > { %3012 = vmatmul.f32.vlgmr.msra.gmra.mxu2 %v2744_v58  ;;  %3375 = vmatpush.msrb.mxu1 %v4830_v32  ;;  %v6208_v58 = vld [vmem:[#allocation57_spill] sm:$0xff] }
 0x41e   : > { %3216 = vmatpush.msrb.mxu2 %v6122_v34  ;;  %3273 = vmatpush.msrb.mxu3 %v4880_v7 }
 0x41f   : > { %3377 = vmatpush.msrb.mxu1 %v4845_v17  ;;  %3318 = vmatpush.msrb.mxu0 %v4869_v15 }
 0x420   : > { %3219 = vmatpush.msrb.mxu2 %v6123_v63  ;;  %3275 = vmatpush.msrb.mxu3 %v4899_v50 }
 0x421   : > { %3379 = vmatpush.msrb.mxu1 %v4860_v25  ;;  %3322 = vmatpush.msrb.mxu0 %v4892_v13 }
 0x422   : > { %3222 = vmatpush.msrb.mxu2 %v4872_v48  ;;  %3277 = vmatpush.msrb.mxu3 %v4917_v5 }
 0x423   : > { %3381 = vmatpush.msrb.mxu1 %v4880_v7  ;;  %3326 = vmatpush.msrb.mxu0 %v4909_v23 }
 0x424   : > { %3225 = vmatpush.msrb.mxu2 %v4883_v3  ;;  %3279 = vmatpush.msrb.mxu3 %v4934_v18 }
 0x425   : > { %3383 = vmatpush.msrb.mxu1 %v4899_v50  ;;  %3330 = vmatpush.msrb.mxu0 %v4929_v2 }
 0x426   : > { %3228 = vmatpush.msrb.mxu2 %v6124_v24  ;;  %3281 = vmatpush.msrb.mxu3 %v6125_v9 }
 0x427   : > { %3385 = vmatpush.msrb.mxu1 %v4917_v5  ;;  %3334 = vmatpush.msrb.mxu0 %v6126_v21 }
 0x428   : > { %3231 = vmatpush.msrb.mxu2 %v6127_v35  ;;  %3283 = vmatpush.msrb.mxu3 %v6128_v39 }
 0x429   : > { %3387 = vmatpush.msrb.mxu1 %v4934_v18  ;;  %3338 = vmatpush.msrb.mxu0 %v6129_v53 }
 0x42a   : > { %3234 = vmatpush.msrb.mxu2 %v6130_v27  ;;  %3285 = vmatpush.msrb.mxu3 %v6131_v51 }
 0x42b   : > { %3389 = vmatpush.msrb.mxu1 %v6125_v9  ;;  %3342 = vmatpush.msrb.mxu0 %v6132_v40 }
 0x42c   : > { %3237 = vmatpush.msrb.mxu2 %v6133_v33  ;;  %3287 = vmatpush.msrb.mxu3 %v6134_v60 }
 0x42d   : > { %3391 = vmatpush.msrb.mxu1 %v6128_v39  ;;  %3346 = vmatpush.msrb.mxu0 %v6135_v16 }
 0x42e   : > { %3240 = vmatpush.msrb.mxu2 %v6136_v14  ;;  %3454 = vmatpush.msra.mxu3 %v6137_v8  ;;  %v6210_v8 = vld [vmem:[#allocation30_spill] sm:$0xff] }
 0x42f   : > { %3393 = vmatpush.msrb.mxu1 %v6131_v51  ;;  %3350 = vmatpush.msrb.mxu0 %v6138_v29 }
 0x430   : > { %3243 = vmatpush.msrb.mxu2 %v6139_v47  ;;  %3460 = vmatpush.msra.mxu3 %v6140_v62  ;;  %v6212_v62 = vld [vmem:[#allocation34_spill] sm:$0xff] }
 0x431   : > { %3395 = vmatpush.msrb.mxu1 %v6134_v60  ;;  %3354 = vmatpush.msrb.mxu0 %v6141_v43 }
 0x432   : > { %3246 = vmatpush.msrb.mxu2 %v6142_v6  ;;  %3466 = vmatpush.msra.mxu3 %v6207_v4 }
 0x433   : > { %3358 = vmatpush.msrb.mxu0 %v6208_v58 }
 0x434   : > { %3249 = vmatpush.msrb.mxu2 %v6209_v19  ;;  %3472 = vmatpush.msra.mxu3 %v6210_v8 }
 0x436   : > { %3409 = vmatpush.msra.mxu2 %v4760_v26  ;;  %3478 = vmatpush.msra.mxu3 %v6211_v61 }
 0x438   : > { %3411 = vmatpush.msra.mxu2 %v4769_v22  ;;  %3484 = vmatpush.msra.mxu3 %v6212_v62 }
 0x43a   : > { %3413 = vmatpush.msra.mxu2 %v4784_v49  ;;  %3490 = vmatpush.msra.mxu3 %v6213_v30 }
 0x43c   : > { %3415 = vmatpush.msra.mxu2 %v4795_v57  ;;  %3496 = vmatpush.msra.mxu3 %v6214_v46 }
 0x43e   : > { %3417 = vmatpush.msra.mxu2 %v4812_v52  ;;  %3502 = vmatpush.msra.mxu3 %v6215_v45 }
 0x440   : > { %3419 = vmatpush.msra.mxu2 %v4830_v32  ;;  %3508 = vmatpush.msra.mxu3 %v6216_v44 }
 0x442   : > { %3421 = vmatpush.msra.mxu2 %v4845_v17  ;;  %3514 = vmatpush.msra.mxu3 %v6217_v42  ;;  %v3961_v42 = vld [vmem:[%s4491_s18 + $0x28] sm:$0xff] }
 0x444   : > { %3423 = vmatpush.msra.mxu2 %v4860_v25  ;;  %3520 = vmatpush.msra.mxu3 %v6218_v12 }
 0x446   : > { %3425 = vmatpush.msra.mxu2 %v4880_v7  ;;  %3526 = vmatpush.msra.mxu3 %v6219_v0 }
 0x448   : > { %3427 = vmatpush.msra.mxu2 %v4899_v50  ;;  %3532 = vmatpush.msra.mxu3 %v6220_v28 }
 0x44a   : > { %3429 = vmatpush.msra.mxu2 %v4917_v5  ;;  %3538 = vmatpush.msra.mxu3 %v6221_v1 }
 0x44c   : > { %3431 = vmatpush.msra.mxu2 %v4934_v18  ;;  %3544 = vmatpush.msra.mxu3 %v6222_v20 }
 0x44e   : > { %3433 = vmatpush.msra.mxu2 %v6125_v9 }
 0x450   : > { %3435 = vmatpush.msra.mxu2 %v6128_v39 }
 0x452   : > { %3437 = vmatpush.msra.mxu2 %v6131_v51 }
 0x454   : > { %3439 = vmatpush.msra.mxu2 %v6134_v60 }
 0x48c   : > { %v2905_v8 = vpop.f32.mrf.mxu0 }
 0x48e   : > { %v2944_v62 = vpop.f32.mrf.mxu1 }
 0x490   : > { %v2851_v56 = vpop.f32.mrf.mxu3 }
 0x498   : > { %v2750_v31 = vpop.f32.mrf.mxu2  ;;  %v3050_v44 = vpop.f32.mrf.mxu3 }
 0x499   : > { %v2852_v4 = vadd.f32 %v2851_v56, %v2750_v31 }
 0x49b   : > { %v2906_v61 = vadd.f32 %v2905_v8, %v2852_v4 }
 0x49d   : > { %v2945_v30 = vadd.f32 %v2944_v62, %v2906_v61 }
 0x4a0   : > { %v3013_v46 = vpop.f32.mrf.mxu2 }
 0x4a1   : > { %v3014_v45 = vadd.f32 %v3013_v46, %v2945_v30 }
 0x4a3   : > { %v3051_v12 = vadd.f32 %v3050_v44, %v3014_v45 }
 0x4a5   : > { %v3053_v0 = vadd.f32 %v3961_v42, %v3051_v12 }
 0x4a7   : > { %4080 = vtanh.f32 %v3053_v0 }
 0x4ad   : > { %v4081_v28 = vpop.eup %4080 }
 0x4ae   : > { %3963 = vst [vmem:[%s5339_s17 + $0x28] sm:$0xff] %v4081_v28  ;;  %v3092_v1 = vand.u32 4294901760, %v4081_v28 }
 0x4b0   : > { %3198 = vmatmul.f32.vlgmr.msra.gmra.mxu1 %v3092_v1  ;;  %v3093_v20 = vsub.f32 %v4081_v28, %v3092_v1 }
 0x4b1   : > { %3605 = vmatpush.msra.mxu1 %v4760_v26 }
 0x4b2   : > { %3252 = vmatmul.f32.vlgmr.msrb.gmra.mxu2 %v3093_v20  ;;  %v3094_v56 = vand.u32 4294901760, %v3093_v20 }
 0x4b3   : > { %3607 = vmatpush.msra.mxu1 %v4769_v22  ;;  %3646 = vmatpush.msrb.mxu2 %v6120_v38 }
 0x4b4   : > { %v3095_v31 = vsub.f32 %v3093_v20, %v3094_v56  ;;  %3291 = vmatmul.f32.vlgmr.msrb.gmra.mxu3 %v3094_v56 }
 0x4b5   : > { %3609 = vmatpush.msra.mxu1 %v4784_v49  ;;  %3713 = vmatpush.msrb.mxu3 %v4760_v26 }
 0x4b6   : > { %v3096_v4 = vand.u32 4294901760, %v3095_v31  ;;  %3650 = vmatpush.msrb.mxu2 %v6121_v41 }
 0x4b7   : > { %3611 = vmatpush.msra.mxu1 %v4795_v57  ;;  %3715 = vmatpush.msrb.mxu3 %v4769_v22 }
 0x4b8   : > { %3097 = vmatmul.f32.vlgmr.msra.gmra.mxu0 %v3096_v4  ;;  %3397 = vmatmul.f32.vlgmr.msrb.gmra.mxu1 %v3092_v1 }
 0x4b9   : > { %3552 = vmatpush.msra.mxu0 %v4767_v11  ;;  %3613 = vmatpush.msra.mxu1 %v4812_v52 }
 0x4ba   : > { %3717 = vmatpush.msrb.mxu3 %v4784_v49  ;;  %3654 = vmatpush.msrb.mxu2 %v4822_v59 }
 0x4bb   : > { %3555 = vmatpush.msra.mxu0 %v4782_v36  ;;  %3615 = vmatpush.msra.mxu1 %v4830_v32 }
 0x4bc   : > { %3719 = vmatpush.msrb.mxu3 %v4795_v57  ;;  %3658 = vmatpush.msrb.mxu2 %v4828_v10  ;;  %v3964_v10 = vld [vmem:[%s4491_s18 + $0x30] sm:$0xff] }
 0x4bd   : > { %3558 = vmatpush.msra.mxu0 %v4805_v37  ;;  %3617 = vmatpush.msra.mxu1 %v4845_v17 }
 0x4be   : > { %3721 = vmatpush.msrb.mxu3 %v4812_v52  ;;  %3662 = vmatpush.msrb.mxu2 %v4854_v54 }
 0x4bf   : > { %3561 = vmatpush.msra.mxu0 %v4815_v55  ;;  %3619 = vmatpush.msra.mxu1 %v4860_v25 }
 0x4c0   : > { %3360 = vmatmul.f32.vlgmr.msrb.gmra.mxu0 %v3092_v1  ;;  %3723 = vmatpush.msrb.mxu3 %v4830_v32 }
 0x4c1   : > { %3564 = vmatpush.msra.mxu0 %v6122_v34  ;;  %3621 = vmatpush.msra.mxu1 %v4880_v7 }
 0x4c2   : > { %3725 = vmatpush.msrb.mxu3 %v4845_v17  ;;  %3666 = vmatpush.msrb.mxu2 %v4869_v15 }
 0x4c3   : > { %3567 = vmatpush.msra.mxu0 %v6123_v63  ;;  %3623 = vmatpush.msra.mxu1 %v4899_v50 }
 0x4c4   : > { %3727 = vmatpush.msrb.mxu3 %v4860_v25  ;;  %3670 = vmatpush.msrb.mxu2 %v4892_v13 }
 0x4c5   : > { %3570 = vmatpush.msra.mxu0 %v4872_v48  ;;  %3625 = vmatpush.msra.mxu1 %v4917_v5 }
 0x4c6   : > { %3729 = vmatpush.msrb.mxu3 %v4880_v7  ;;  %3674 = vmatpush.msrb.mxu2 %v4909_v23 }
 0x4c7   : > { %3573 = vmatpush.msra.mxu0 %v4883_v3  ;;  %3627 = vmatpush.msra.mxu1 %v4934_v18 }
 0x4c8   : > { %3731 = vmatpush.msrb.mxu3 %v4899_v50  ;;  %3678 = vmatpush.msrb.mxu2 %v4929_v2 }
 0x4c9   : > { %3576 = vmatpush.msra.mxu0 %v6124_v24  ;;  %3629 = vmatpush.msra.mxu1 %v6125_v9  ;;  %v3967_v24 = vld [vmem:[%s4491_s18 + $0x38] sm:$0xff] }
 0x4ca   : > { %3733 = vmatpush.msrb.mxu3 %v4917_v5  ;;  %3682 = vmatpush.msrb.mxu2 %v6126_v21 }
 0x4cb   : > { %3579 = vmatpush.msra.mxu0 %v6127_v35  ;;  %3631 = vmatpush.msra.mxu1 %v6128_v39 }
 0x4cc   : > { %3735 = vmatpush.msrb.mxu3 %v4934_v18  ;;  %3686 = vmatpush.msrb.mxu2 %v6129_v53 }
 0x4cd   : > { %3582 = vmatpush.msra.mxu0 %v6130_v27  ;;  %3633 = vmatpush.msra.mxu1 %v6131_v51 }
 0x4ce   : > { %3737 = vmatpush.msrb.mxu3 %v6125_v9  ;;  %3690 = vmatpush.msrb.mxu2 %v6132_v40 }
 0x4cf   : > { %3585 = vmatpush.msra.mxu0 %v6133_v33  ;;  %3635 = vmatpush.msra.mxu1 %v6134_v60 }
 0x4d0   : > { %3739 = vmatpush.msrb.mxu3 %v6128_v39  ;;  %3694 = vmatpush.msrb.mxu2 %v6135_v16 }
 0x4d1   : > { %3588 = vmatpush.msra.mxu0 %v6136_v14 }
 0x4d2   : > { %3741 = vmatpush.msrb.mxu3 %v6131_v51  ;;  %3698 = vmatpush.msrb.mxu2 %v6138_v29 }
 0x4d3   : > { %3591 = vmatpush.msra.mxu0 %v6139_v47 }
 0x4d4   : > { %3743 = vmatpush.msrb.mxu3 %v6134_v60  ;;  %3702 = vmatpush.msrb.mxu2 %v6141_v43 }
 0x4d5   : > { %3594 = vmatpush.msra.mxu0 %v6142_v6 }
 0x4d6   : > { %3706 = vmatpush.msrb.mxu2 %v6208_v58 }
 0x4d7   : > { %3597 = vmatpush.msra.mxu0 %v6209_v19 }
 0x52d   : > { %v3199_v26 = vpop.f32.mrf.mxu1 }
 0x535   : > { %v3098_v11 = vpop.f32.mrf.mxu0  ;;  %v3253_v36 = vpop.f32.mrf.mxu2 }
 0x536   : > { %v3200_v22 = vadd.f32 %v3199_v26, %v3098_v11  ;;  %v3398_v59 = vpop.f32.mrf.mxu1 }
 0x537   : > { %v3292_v57 = vpop.f32.mrf.mxu3 }
 0x538   : > { %v3254_v49 = vadd.f32 %v3253_v36, %v3200_v22 }
 0x53a   : > { %v3293_v37 = vadd.f32 %v3292_v57, %v3254_v49 }
 0x53d   : > { %v3361_v52 = vpop.f32.mrf.mxu0 }
 0x53e   : > { %v3362_v55 = vadd.f32 %v3361_v52, %v3293_v37 }
 0x540   : > { %v3399_v32 = vadd.f32 %v3398_v59, %v3362_v55 }
 0x542   : > { %v3401_v17 = vadd.f32 %v3964_v10, %v3399_v32 }
 0x544   : > { %4082 = vtanh.f32 %v3401_v17 }
 0x54a   : > { %v4083_v54 = vpop.eup %4082 }
 0x54b   : > { %3966 = vst [vmem:[%s5339_s17 + $0x30] sm:$0xff] %v4083_v54  ;;  %v3440_v25 = vand.u32 4294901760, %v4083_v54 }
 0x54d   : > { %3546 = vmatmul.f32.vlgmr.msra.gmra.mxu3 %v3440_v25  ;;  %v3441_v15 = vsub.f32 %v4083_v54, %v3440_v25 }
 0x54f   : > { %3600 = vmatmul.f32.vlgmr.msra.gmra.mxu0 %v3441_v15  ;;  %v3442_v48 = vand.u32 4294901760, %v3441_v15 }
 0x551   : > { %3639 = vmatmul.f32.vlgmr.msra.gmra.mxu1 %v3442_v48  ;;  %v3443_v7 = vsub.f32 %v3441_v15, %v3442_v48 }
 0x553   : > { %v3444_v3 = vand.u32 4294901760, %v3443_v7 }
 0x555   : > { %3445 = vmatmul.f32.vlgmr.msra.gmra.mxu2 %v3444_v3  ;;  %3745 = vmatmul.f32.vlgmr.msrb.gmra.mxu3 %v3440_v25 }
 0x55d   : > { %3708 = vmatmul.f32.vlgmr.msrb.gmra.mxu2 %v3440_v25 }
 0x5cc   : > { %v3601_v5 = vpop.f32.mrf.mxu0 }
 0x5ce   : > { %v3640_v18 = vpop.f32.mrf.mxu1 }
 0x5d0   : > { %v3547_v13 = vpop.f32.mrf.mxu3 }
 0x5d8   : > { %v3446_v50 = vpop.f32.mrf.mxu2  ;;  %v3746_v63 = vpop.f32.mrf.mxu3 }
 0x5d9   : > { %v3548_v23 = vadd.f32 %v3547_v13, %v3446_v50 }
 0x5db   : > { %v3602_v2 = vadd.f32 %v3601_v5, %v3548_v23 }
 0x5dd   : > { %v3641_v38 = vadd.f32 %v3640_v18, %v3602_v2 }
 0x5e0   : > { %v3709_v41 = vpop.f32.mrf.mxu2 }
 0x5e1   : > { %v3710_v34 = vadd.f32 %v3709_v41, %v3641_v38 }
 0x5e3   : > { %v3747_v9 = vadd.f32 %v3746_v63, %v3710_v34 }
 0x5e5   : > { %v3749_v21 = vadd.f32 %v3967_v24, %v3747_v9 }
 0x5e7   : > { %4084 = vtanh.f32 %v3749_v21 }
 0x5eb   : > { %3757 = sbr.rel (%p6223_p1) target bundleno = 1521 (0x5f1), region = 64 }
 0x5ed   : > { %v4085_v35 = vpop.eup %4084 }
 0x5ee   : > { %3969 = vst [vmem:[%s5339_s17 + $0x38] sm:$0xff] %v4085_v35 }
 0x5ef   : > { %3754 = vst [vmem:[#allocation2] sm:$0xff] %v4085_v35 }
 0x5f0   : > { %3758 = vst [vmem:[#allocation13] sm:$0xff] %v4085_v35 }
 0x5f1 PF: > { %s3979_s8 = sshll.u32 %s4383_s25, 6  ;;  %s3772_s30 = sshll.u32 %s4510_s19, 4  ;;  %s3773_s30 = int_to_ptr.vmem [resolvable:$true] %s3772_s30 }
 0x5f2   : > { %s3771_s18 = scalar_lea.hbm %s5951_s5, %s3979_s8  ;;  %s3760_s20 = scalar_lea.sflag [#allocation6], %s277_s14 }
 0x5f3   : > { %s3774_s9 = sshll.u32 %s3771_s18, 4  ;;  %s4226_s10 = scalar_lea.hbm %s5951_s5, 128  ;;  %s3775_s9 = int_to_ptr.hbm [resolvable:$true] %s3774_s9 }
 0x5f4   : > { %s4220_s26 = sshra.s32 %s3775_s9, 4  ;;  %s4221_s26 = int_to_ptr.hbm [resolvable:$true] %s4220_s26 }
 0x5f5   : > { %s4222_s11 = scalar_lea.hbm %s4221_s26, 64  ;;  %p4227_p13 = scmp.lt.s32.totalorder %s4221_s26, %s5951_s5 }
 0x5f6   : > { %p4223_p9 = scmp.ne.s32.totalorder %s4221_s26, %s4222_s11  ;;  %p4228_p0 = scmp.lt.s32.totalorder %s4226_s10, %s4222_s11 }
 0x5f8   : > { %p4224_p12 = pnand %p4223_p9, %p4452_p10  ;;  %p4229_p3 = por %p4228_p0, %p4227_p13 }
 0x5fa   : > { %p4225_p11 = pneg %p4224_p12 }
 0x5fc   : > { %p4230_p5 = pnand %p4229_p3, %p4225_p11 }
 0x5fe   : > { %4233 = shalt.err (!%p4230_p5)
}
 0x5ff   : > { %s4324_s14 = smov 128   ;;  %s4325_s19 = smov 8  }
 0x600   : > { %3994 = dma.vmem_to_hbm [thread:$0]  (%p4452_p10), %s3773_s30, 1024, %s3775_s9, %s3760_s20, %s4324_s14, %s4324_s14, %s4325_s19  }
 0x601   : > { %s3789_s18 = sshll.u32 %s5952_s6, 4  ;;  %s4326_s29 = smov [#allocation13]   ;;  %s3790_s18 = int_to_ptr.hbm [resolvable:$true] %s3789_s18 }
 0x602   : > { %s3787_s16 = sshll.u32 %s4326_s29, 4  ;;  %p6224_p7 = scmp.eq.s32.totalorder %s4383_s25, 1  ;;  %s3788_s16 = int_to_ptr.vmem [resolvable:$true] %s3787_s16 }
 0x604   : > { %3996 = dma.vmem_to_hbm [thread:$0]  (%p6224_p7), %s3788_s16, 128, %s3790_s18, [#allocation14]  }
 0x605   : > { %p6225_p2 = pmov %p6224_p7 }
 0x607   : > { %4295 = dma.done.wait (%p6225_p2), [#allocation14], 128   ;;  %p6226_p4 = pmov %p6225_p2 }
 0x609   : > { %4297 = vsyncadd (%p6226_p4), [#allocation14], 4294967168 }
 0x60a PF: > { %s3806_s13 = sand.u32 1, %s4304_s21   ;;  %p6227_p10 = scmp.ge.s32.totalorder %s4316_s24, 2 }
 0x60b   : > { %s3807_s30 = scalar_lea.sflag [#allocation6], %s3806_s13 }
 0x60c   : > { %p4015_p8 = pnand %p6227_p10, %p4397_p6 }
 0x60e   : > { %p4016_p1 = pneg %p4015_p8 }
 0x610   : > { %4299 = dma.done.wait (%p4016_p1), %s3807_s30, 1024  }
 0x611   : > { %4301 = vsyncadd (%p4016_p1), %s3807_s30, 4294966272  ;;  %p23_p9 = scmp.ge.s32.totalorder %s4433_s7, 4   ;;  %s6228_s21 = smov %s4308_s22 }
 0x612   : > { %s6229_s22 = smov %s4312_s23  ;;  %s6230_s23 = smov %s4448_s12 }
 0x613   : > { %s6231_s24 = smov %s4433_s7  ;;  %25 = sbr.rel (!%p23_p9) target bundleno = 8 (0x8), region = 130 }
 0x618   :  { %3813 = vsyncpa [#allocation5], 1 }
 0x619   :  { %3815 = vsyncpa [#allocation5 + $0x1], 1 }
 0x61a   :  { %3816 = vsyncpa [#allocation8], 1 }
 0x61b   :  { %3818 = vsyncpa [#allocation8 + $0x1], 1 }
 0x61c   :  { %3819 = vsyncpa [#allocation11], 1 }
 0x61d   :  { %3820 = vsyncpa [#allocation6], 1 }
 0x61e   :  { %3822 = vsyncpa [#allocation6 + $0x1], 1 }
 0x61f   :  { %3823 = vsyncpa [#allocation14], 1 }

</bundles_post_ra>
